<compile_context>
chip_gen: v7x
topology: tpu7x:2x2x1
jax: 0.10.0
libtpu: 0.0.40
codegen_flags: <defaults>
</compile_context>

<pallas_src>
import functools

import jax
import jax.numpy as jnp
from jax.experimental import pallas as pl
from jax.experimental.pallas import tpu as pltpu

_LANE = 128
_SUBLANE = 8


def _round_up(x, m):
    return ((x + m - 1) // m) * m


def _snli_kernel(sa_ref, sb_ref,
                 we_ref, be_ref,
                 w1a_ref, w1b_ref, w1c_ref, w1d_ref, b1_ref,
                 w2_ref, b2_ref,
                 w3_ref, b3_ref,
                 out_ref,
                 acc_a, acc_b,
                 *, inv_seq_len):
    f32, bf16 = jnp.float32, jnp.bfloat16
    j = pl.program_id(1)

    # --- mean-pool accumulation over the (tiled) sequence axis.  Sentences are
    #     streamed in the caller's dtype; the reduce accumulates straight into
    #     a small f32 scratch (no widened copy of the whole tile). ---
    @pl.when(j == 0)
    def _():
        acc_a[...] = jnp.zeros_like(acc_a)
        acc_b[...] = jnp.zeros_like(acc_b)

    acc_a[...] += jnp.sum(sa_ref[...], axis=1, dtype=f32)
    acc_b[...] += jnp.sum(sb_ref[...], axis=1, dtype=f32)

    # --- everything after the pool runs once, on the last sequence block ---
    @pl.when(j == pl.num_programs(1) - 1)
    def _():
        TB = acc_a.shape[0]
        mean_a = acc_a[...] * inv_seq_len            # (TB, E) f32
        mean_b = acc_b[...] * inv_seq_len

        # encoder Linear(E, E): one stacked (2*TB, E) @ (E, E) MXU pass,
        # bf16 operands, f32 accumulation, f32 bias.
        stacked = jnp.concatenate([mean_a, mean_b], axis=0).astype(bf16)
        enc = jnp.dot(stacked, we_ref[...], preferred_element_type=f32) + be_ref[...]
        enc_a = enc[:TB, :]
        enc_b = enc[TB:, :]

        # interaction features (f32 on the VPU)
        f1 = jnp.abs(enc_a - enc_b)
        f2 = enc_a * enc_b

        # fn1: Linear(4E, H) as four accumulating dots against the w1 slabs
        # (no (TB, 4E) concat intermediate).  No activations between fn1/2/3,
        # matching the reference forward.
        x = (jnp.dot(enc_a.astype(bf16), w1a_ref[...], preferred_element_type=f32)
             + jnp.dot(enc_b.astype(bf16), w1b_ref[...], preferred_element_type=f32)
             + jnp.dot(f1.astype(bf16), w1c_ref[...], preferred_element_type=f32)
             + jnp.dot(f2.astype(bf16), w1d_ref[...], preferred_element_type=f32)
             + b1_ref[...])

        # fn2: Linear(H, H)
        x = jnp.dot(x.astype(bf16), w2_ref[...], preferred_element_type=f32) + b2_ref[...]

        # fn3: Linear(H, C_pad) -> lane-dense (TB, 128) store
        out_ref[...] = (jnp.dot(x.astype(bf16), w3_ref[...], preferred_element_type=f32)
                        + b3_ref[...])


def _vmem_limit_bytes():
    try:
        cap = int(pltpu.get_tpu_info().vmem_capacity_bytes)
    except Exception:
        cap = 64 * 1024 * 1024      # conservative fallback (v7x per-TC VMEM)
    return (cap * 3) // 4           # leave headroom below physical VMEM


def _choose_seq_tile(S, max_ts):
    """Largest multiple-of-8 divisor of S that is <= max_ts (else smallest, else S)."""
    divisors = [d for d in range(_SUBLANE, S, _SUBLANE) if S % d == 0]
    fitting = [d for d in divisors if d <= max_ts]
    if fitting:
        return max(fitting)
    if divisors:
        return min(divisors)
    return S


def _plan_tiles(B, S, E, sent_budget, batch_tile, seq_tile):
    """Pick (batch_tile, seq_tile) so the double-buffered sentence windows fit VMEM."""
    per_row_step = 2 * 2 * 4 * E    # 2 sentences x 2 DMA buffers x 4 B(f32) x E lanes

    if batch_tile is not None:
        tb = max(1, min(batch_tile, B))
    elif B <= _SUBLANE:
        tb = B
    elif B < 2 * _SUBLANE:
        tb = _SUBLANE               # >= 2 grid blocks -> pipelining + megacore (v7x)
    else:
        tb = max(_SUBLANE, min(128, (B // 2) // _SUBLANE * _SUBLANE))

    def fit_ts(tb_):
        if seq_tile is not None:
            ts_ = max(1, min(seq_tile, S))
        else:
            max_rows = max(1, sent_budget // per_row_step)   # limit on tb*ts
            if tb_ * S <= max_rows:
                ts_ = S
            else:
                ts_ = _choose_seq_tile(S, max(_SUBLANE, max_rows // tb_))
        if ts_ != S and (S % ts_ != 0 or ts_ % _SUBLANE != 0):
            ts_ = S                  # sequence tiles must divide S exactly
        return ts_

    ts = fit_ts(tb)
    while tb > _SUBLANE and tb * ts * per_row_step > sent_budget:
        tb = max(_SUBLANE, tb // 2)
        ts = fit_ts(tb)
    return tb, ts


def snli_classifier_forward(sentence_a, sentence_b, params, *,
                            batch_tile=None, seq_tile=None):
    """Full SNLIClassifier forward pass in one gridded Pallas kernel.

    sentence_a, sentence_b : (B, S, E) float32 word embeddings (streamed as-is)
    params : dict with we, be, w1, b1, w2, b2, w3, b3 (float32, unpadded)
    """
    B, S, E = sentence_a.shape
    H = params["w2"].shape[0]
    C = params["w3"].shape[1]

    H_pad = _round_up(H, _LANE)
    C_pad = _round_up(C, _LANE)

    f32, bf16 = jnp.float32, jnp.bfloat16

    # Weights are tiny relative to the sentences: pad/cast them in the wrapper.
    we = params["we"].astype(bf16)                                        # (E, E)
    be = params["be"].astype(f32)                                         # (1, E)
    w1_slabs = tuple(
        jnp.pad(params["w1"][k * E:(k + 1) * E, :],
                ((0, 0), (0, H_pad - H))).astype(bf16)
        for k in range(4)
    )                                                                     # 4 x (E, H_pad)
    b1 = jnp.pad(params["b1"], ((0, 0), (0, H_pad - H))).astype(f32)
    w2 = jnp.pad(params["w2"], ((0, H_pad - H), (0, H_pad - H))).astype(bf16)
    b2 = jnp.pad(params["b2"], ((0, 0), (0, H_pad - H))).astype(f32)
    w3 = jnp.pad(params["w3"], ((0, H_pad - H), (0, C_pad - C))).astype(bf16)
    b3 = jnp.pad(params["b3"], ((0, 0), (0, C_pad - C))).astype(f32)

    weights = (we, be, *w1_slabs, b1, w2, b2, w3, b3)

    # VMEM plan: explicit scoped limit (raises v5e's 16 MiB default, stays under
    # v7x's 64 MiB physical); sentence double-buffers sized to fit beneath it.
    vmem_limit = _vmem_limit_bytes()
    weight_bytes = 2 * sum(int(w.size) * w.dtype.itemsize for w in weights)  # worst case 2x buffered
    sent_budget = max(vmem_limit - weight_bytes - (8 << 20), 2 << 20)
    TB, TS = _plan_tiles(B, S, E, sent_budget, batch_tile, seq_tile)

    num_b = -(-B // TB)      # cdiv; partial last batch block -> masked output rows
    num_s = S // TS

    sent_spec = pl.BlockSpec((TB, TS, E), lambda i, j: (i, j, 0))

    def const_spec(shape, single_buffer):
        n = len(shape)
        idx = lambda i, j, _n=n: (0,) * _n
        if single_buffer and hasattr(pl, "Buffered"):
            try:
                # Constant index map -> weights never change; skip double-buffering.
                return pl.BlockSpec(shape, idx, pipeline_mode=pl.Buffered(1))
            except TypeError:
                pass
        return pl.BlockSpec(shape, idx)

    kernel = functools.partial(_snli_kernel, inv_seq_len=1.0 / S)

    def run(single_buffer_weights):
        return pl.pallas_call(
            kernel,
            out_shape=jax.ShapeDtypeStruct((B, C_pad), f32),
            grid=(num_b, num_s),
            in_specs=[sent_spec, sent_spec]
                     + [const_spec(w.shape, single_buffer_weights) for w in weights],
            out_specs=pl.BlockSpec((TB, C_pad), lambda i, j: (i, 0)),
            scratch_shapes=[pltpu.VMEM((TB, E), f32),
                            pltpu.VMEM((TB, E), f32)],
            compiler_params=pltpu.CompilerParams(
                dimension_semantics=("parallel", "arbitrary"),
                vmem_limit_bytes=int(vmem_limit),
            ),
        )(sentence_a, sentence_b, *weights)

    try:
        out_padded = run(True)
    except Exception:
        # pl.Buffered(1) not supported by this jax version -> plain (double-buffered) weights.
        out_padded = run(False)

    # Drop the zero-padded logit columns.
    return out_padded[:, :C]


def init_params(key, embedding_dim, hidden_dim, n_classes=3):
    """Deterministic synthetic parameter init (shapes match the nn.Module)."""
    ks = jax.random.split(key, 8)
    scale = 0.05
    E, H = embedding_dim, hidden_dim
    return {
        # encoder Linear(E, E)
        "we": scale * jax.random.normal(ks[0], (E, E), jnp.float32),
        "be": scale * jax.random.normal(ks[1], (1, E), jnp.float32),
        # fn1: Linear(4E, H)
        "w1": scale * jax.random.normal(ks[2], (4 * E, H), jnp.float32),
        "b1": scale * jax.random.normal(ks[3], (1, H), jnp.float32),
        # fn2: Linear(H, H)
        "w2": scale * jax.random.normal(ks[4], (H, H), jnp.float32),
        "b2": scale * jax.random.normal(ks[5], (1, H), jnp.float32),
        # fn3: Linear(H, 3)
        "w3": scale * jax.random.normal(ks[6], (H, n_classes), jnp.float32),
        "b3": scale * jax.random.normal(ks[7], (1, n_classes), jnp.float32),
    }


if __name__ == "__main__":
    # Small shapes consistent with the module's forward semantics.
    B, S, E, H = 2, 8, 32, 64

    key = jax.random.PRNGKey(0)
    k_a, k_b, k_p = jax.random.split(key, 3)

    sentence_a = jax.random.normal(k_a, (B, S, E), jnp.float32)
    sentence_b = jax.random.normal(k_b, (B, S, E), jnp.float32)
    params = init_params(k_p, embedding_dim=E, hidden_dim=H)

    out = snli_classifier_forward(sentence_a, sentence_b, params)
    out = jax.block_until_ready(out)

    # Pure-JAX reference mirroring the kernel's numerics
    # (f32 mean-pool, bf16 matmul operands, f32 accumulation, f32 biases).
    bf16, f32 = jnp.bfloat16, jnp.float32
    we = params["we"].astype(bf16)
    w1 = params["w1"].astype(bf16)
    w2 = params["w2"].astype(bf16)
    w3 = params["w3"].astype(bf16)
    be, b1, b2, b3 = params["be"], params["b1"], params["b2"], params["b3"]

    mean_a = jnp.mean(sentence_a, axis=1)
    mean_b = jnp.mean(sentence_b, axis=1)
    enc_a = jnp.dot(mean_a.astype(bf16), we, preferred_element_type=f32) + be
    enc_b = jnp.dot(mean_b.astype(bf16), we, preferred_element_type=f32) + be
    f1 = jnp.abs(enc_a - enc_b)
    f2 = enc_a * enc_b
    feats = jnp.concatenate([enc_a, enc_b, f1, f2], axis=1).astype(bf16)
    x = jnp.dot(feats, w1, preferred_element_type=f32) + b1
    x = jnp.dot(x.astype(bf16), w2, preferred_element_type=f32) + b2
    ref = jnp.dot(x.astype(bf16), w3, preferred_element_type=f32) + b3

    assert out.shape == (B, 3), out.shape
    max_diff = jnp.max(jnp.abs(out - ref))
    assert jnp.allclose(out, ref, atol=1e-2, rtol=1e-2), f"max_diff={max_diff}"

    print("KERNEL_OK")
</pallas_src>

<mosaic_0001>
module attributes {stable_mosaic.version = 11 : i64} {
  func.func @_snli_kernel(%arg0: i32, %arg1: i32, %arg2: memref<2x8x32xf32, #tpu.memory_space<vmem>>, %arg3: memref<2x8x32xf32, #tpu.memory_space<vmem>>, %arg4: memref<32x32xbf16, #tpu.memory_space<vmem>>, %arg5: memref<1x32xf32, #tpu.memory_space<vmem>>, %arg6: memref<32x128xbf16, #tpu.memory_space<vmem>>, %arg7: memref<32x128xbf16, #tpu.memory_space<vmem>>, %arg8: memref<32x128xbf16, #tpu.memory_space<vmem>>, %arg9: memref<32x128xbf16, #tpu.memory_space<vmem>>, %arg10: memref<1x128xf32, #tpu.memory_space<vmem>>, %arg11: memref<128x128xbf16, #tpu.memory_space<vmem>>, %arg12: memref<1x128xf32, #tpu.memory_space<vmem>>, %arg13: memref<128x128xbf16, #tpu.memory_space<vmem>>, %arg14: memref<1x128xf32, #tpu.memory_space<vmem>>, %arg15: memref<2x128xf32, #tpu.memory_space<vmem>>, %arg16: memref<2x32xf32, #tpu.memory_space<vmem>>, %arg17: memref<2x32xf32, #tpu.memory_space<vmem>>) attributes {dimension_semantics = [#tpu.dimension_semantics<parallel>, #tpu.dimension_semantics<arbitrary>], iteration_bounds = array<i64: 1, 1>, scalar_prefetch = 0 : i64, scratch_operands = 2 : i64, tpu.core_type = #tpu.core_type<tc>, window_params = [{transform_indices = @transform_0, window_bounds = array<i64: 2, 8, 32>}, {transform_indices = @transform_1, window_bounds = array<i64: 2, 8, 32>}, {pipeline_mode = #tpu.pipeline_mode<synchronous>, transform_indices = @transform_2, window_bounds = array<i64: 32, 32>}, {pipeline_mode = #tpu.pipeline_mode<synchronous>, transform_indices = @transform_3, window_bounds = array<i64: 1, 32>}, {pipeline_mode = #tpu.pipeline_mode<synchronous>, transform_indices = @transform_4, window_bounds = array<i64: 32, 128>}, {pipeline_mode = #tpu.pipeline_mode<synchronous>, transform_indices = @transform_5, window_bounds = array<i64: 32, 128>}, {pipeline_mode = #tpu.pipeline_mode<synchronous>, transform_indices = @transform_6, window_bounds = array<i64: 32, 128>}, {pipeline_mode = #tpu.pipeline_mode<synchronous>, transform_indices = @transform_7, window_bounds = array<i64: 32, 128>}, {pipeline_mode = #tpu.pipeline_mode<synchronous>, transform_indices = @transform_8, window_bounds = array<i64: 1, 128>}, {pipeline_mode = #tpu.pipeline_mode<synchronous>, transform_indices = @transform_9, window_bounds = array<i64: 128, 128>}, {pipeline_mode = #tpu.pipeline_mode<synchronous>, transform_indices = @transform_10, window_bounds = array<i64: 1, 128>}, {pipeline_mode = #tpu.pipeline_mode<synchronous>, transform_indices = @transform_11, window_bounds = array<i64: 128, 128>}, {pipeline_mode = #tpu.pipeline_mode<synchronous>, transform_indices = @transform_12, window_bounds = array<i64: 1, 128>}, {transform_indices = @transform_13, window_bounds = array<i64: 2, 128>}]} {
    %c0_i32 = arith.constant 0 : i32
    %0 = arith.cmpi eq, %arg1, %c0_i32 : i32
    %1 = arith.extui %0 : i1 to i32
    %c0_i32_0 = arith.constant 0 : i32
    %2 = arith.cmpi ne, %1, %c0_i32_0 : i32
    scf.if %2 {
      %cst_17 = arith.constant 0.000000e+00 : f32
      %16 = vector.broadcast %cst_17 : f32 to vector<2x32xf32>
      %c0_18 = arith.constant 0 : index
      %c0_19 = arith.constant 0 : index
      %17 = vector.load %arg16[%c0_18, %c0_19] : memref<2x32xf32, #tpu.memory_space<vmem>>, vector<2x32xf32>
      tpu.vector_store %arg16[%c0_18, %c0_19], %16 {strides = array<i32>} : memref<2x32xf32, #tpu.memory_space<vmem>>, vector<2x32xf32>,
      %cst_20 = arith.constant 0.000000e+00 : f32
      %18 = vector.broadcast %cst_20 : f32 to vector<2x32xf32>
      %c0_21 = arith.constant 0 : index
      %c0_22 = arith.constant 0 : index
      %19 = vector.load %arg17[%c0_21, %c0_22] : memref<2x32xf32, #tpu.memory_space<vmem>>, vector<2x32xf32>
      tpu.vector_store %arg17[%c0_21, %c0_22], %18 {strides = array<i32>} : memref<2x32xf32, #tpu.memory_space<vmem>>, vector<2x32xf32>,
    } else {
    }
    %c0 = arith.constant 0 : index
    %c0_1 = arith.constant 0 : index
    %3 = vector.load %arg16[%c0, %c0_1] : memref<2x32xf32, #tpu.memory_space<vmem>>, vector<2x32xf32>
    %c0_2 = arith.constant 0 : index
    %c0_3 = arith.constant 0 : index
    %c0_4 = arith.constant 0 : index
    %4 = vector.load %arg2[%c0_2, %c0_3, %c0_4] : memref<2x8x32xf32, #tpu.memory_space<vmem>>, vector<2x8x32xf32>
    %cst = arith.constant dense<0.000000e+00> : vector<2x32xf32>
    %5 = vector.multi_reduction <add>, %4, %cst [1] : vector<2x8x32xf32> to vector<2x32xf32>
    %6 = arith.addf %3, %5 : vector<2x32xf32>
    %c0_5 = arith.constant 0 : index
    %c0_6 = arith.constant 0 : index
    %7 = vector.load %arg16[%c0_5, %c0_6] : memref<2x32xf32, #tpu.memory_space<vmem>>, vector<2x32xf32>
    tpu.vector_store %arg16[%c0_5, %c0_6], %6 {strides = array<i32>} : memref<2x32xf32, #tpu.memory_space<vmem>>, vector<2x32xf32>,
    %c0_7 = arith.constant 0 : index
    %c0_8 = arith.constant 0 : index
    %8 = vector.load %arg17[%c0_7, %c0_8] : memref<2x32xf32, #tpu.memory_space<vmem>>, vector<2x32xf32>
    %c0_9 = arith.constant 0 : index
    %c0_10 = arith.constant 0 : index
    %c0_11 = arith.constant 0 : index
    %9 = vector.load %arg3[%c0_9, %c0_10, %c0_11] : memref<2x8x32xf32, #tpu.memory_space<vmem>>, vector<2x8x32xf32>
    %cst_12 = arith.constant dense<0.000000e+00> : vector<2x32xf32>
    %10 = vector.multi_reduction <add>, %9, %cst_12 [1] : vector<2x8x32xf32> to vector<2x32xf32>
    %11 = arith.addf %8, %10 : vector<2x32xf32>
    %c0_13 = arith.constant 0 : index
    %c0_14 = arith.constant 0 : index
    %12 = vector.load %arg17[%c0_13, %c0_14] : memref<2x32xf32, #tpu.memory_space<vmem>>, vector<2x32xf32>
    tpu.vector_store %arg17[%c0_13, %c0_14], %11 {strides = array<i32>} : memref<2x32xf32, #tpu.memory_space<vmem>>, vector<2x32xf32>,
    %c0_i32_15 = arith.constant 0 : i32
    %13 = arith.cmpi eq, %arg1, %c0_i32_15 : i32
    %14 = arith.extui %13 : i1 to i32
    %c0_i32_16 = arith.constant 0 : i32
    %15 = arith.cmpi ne, %14, %c0_i32_16 : i32
    scf.if %15 {
      %c0_17 = arith.constant 0 : index
      %c0_18 = arith.constant 0 : index
      %16 = vector.load %arg16[%c0_17, %c0_18] : memref<2x32xf32, #tpu.memory_space<vmem>>, vector<2x32xf32>
      %cst_19 = arith.constant 1.250000e-01 : f32
      %17 = vector.broadcast %cst_19 : f32 to vector<2x32xf32>
      %18 = arith.mulf %16, %17 : vector<2x32xf32>
      %c0_20 = arith.constant 0 : index
      %c0_21 = arith.constant 0 : index
      %19 = vector.load %arg17[%c0_20, %c0_21] : memref<2x32xf32, #tpu.memory_space<vmem>>, vector<2x32xf32>
      %cst_22 = arith.constant 1.250000e-01 : f32
      %20 = vector.broadcast %cst_22 : f32 to vector<2x32xf32>
      %21 = arith.mulf %19, %20 : vector<2x32xf32>
      %22 = tpu.concatenate %18, %21 in 0 : vector<2x32xf32>, vector<2x32xf32> -> vector<4x32xf32>
      %23 = arith.truncf %22 : vector<4x32xf32> to vector<4x32xbf16>
      %c0_23 = arith.constant 0 : index
      %c0_24 = arith.constant 0 : index
      %24 = vector.load %arg4[%c0_23, %c0_24] : memref<32x32xbf16, #tpu.memory_space<vmem>>, vector<32x32xbf16>
      %cst_25 = arith.constant dense<0.000000e+00> : vector<4x32xf32>
      %25 = tpu.matmul %23, %24, %cst_25 {dimension_numbers = #tpu.dot_dimension_numbers<[1], [0], [0], [1], [0, 0, 1, 1], [], []>} : vector<4x32xbf16>, vector<32x32xbf16>, vector<4x32xf32> -> vector<4x32xf32>
      %c0_26 = arith.constant 0 : index
      %c0_27 = arith.constant 0 : index
      %26 = vector.load %arg5[%c0_26, %c0_27] : memref<1x32xf32, #tpu.memory_space<vmem>>, vector<1x32xf32>
      %27 = vector.broadcast %26 : vector<1x32xf32> to vector<4x32xf32>
      %28 = arith.addf %25, %27 : vector<4x32xf32>
      %29 = vector.extract_strided_slice %28 {offsets = [0, 0], sizes = [2, 32], strides = [1, 1]} : vector<4x32xf32> to vector<2x32xf32>
      %30 = vector.extract_strided_slice %28 {offsets = [2, 0], sizes = [2, 32], strides = [1, 1]} : vector<4x32xf32> to vector<2x32xf32>
      %31 = arith.subf %29, %30 : vector<2x32xf32>
      %32 = math.absf %31 : vector<2x32xf32>
      %33 = arith.mulf %29, %30 : vector<2x32xf32>
      %34 = arith.truncf %29 : vector<2x32xf32> to vector<2x32xbf16>
      %c0_28 = arith.constant 0 : index
      %c0_29 = arith.constant 0 : index
      %35 = vector.load %arg6[%c0_28, %c0_29] : memref<32x128xbf16, #tpu.memory_space<vmem>>, vector<32x128xbf16>
      %cst_30 = arith.constant dense<0.000000e+00> : vector<2x128xf32>
      %36 = tpu.matmul %34, %35, %cst_30 {dimension_numbers = #tpu.dot_dimension_numbers<[1], [0], [0], [1], [0, 0, 1, 1], [], []>} : vector<2x32xbf16>, vector<32x128xbf16>, vector<2x128xf32> -> vector<2x128xf32>
      %37 = arith.truncf %30 : vector<2x32xf32> to vector<2x32xbf16>
      %c0_31 = arith.constant 0 : index
      %c0_32 = arith.constant 0 : index
      %38 = vector.load %arg7[%c0_31, %c0_32] : memref<32x128xbf16, #tpu.memory_space<vmem>>, vector<32x128xbf16>
      %cst_33 = arith.constant dense<0.000000e+00> : vector<2x128xf32>
      %39 = tpu.matmul %37, %38, %cst_33 {dimension_numbers = #tpu.dot_dimension_numbers<[1], [0], [0], [1], [0, 0, 1, 1], [], []>} : vector<2x32xbf16>, vector<32x128xbf16>, vector<2x128xf32> -> vector<2x128xf32>
      %40 = arith.addf %36, %39 : vector<2x128xf32>
      %41 = arith.truncf %32 : vector<2x32xf32> to vector<2x32xbf16>
      %c0_34 = arith.constant 0 : index
      %c0_35 = arith.constant 0 : index
      %42 = vector.load %arg8[%c0_34, %c0_35] : memref<32x128xbf16, #tpu.memory_space<vmem>>, vector<32x128xbf16>
      %cst_36 = arith.constant dense<0.000000e+00> : vector<2x128xf32>
      %43 = tpu.matmul %41, %42, %cst_36 {dimension_numbers = #tpu.dot_dimension_numbers<[1], [0], [0], [1], [0, 0, 1, 1], [], []>} : vector<2x32xbf16>, vector<32x128xbf16>, vector<2x128xf32> -> vector<2x128xf32>
      %44 = arith.addf %40, %43 : vector<2x128xf32>
      %45 = arith.truncf %33 : vector<2x32xf32> to vector<2x32xbf16>
      %c0_37 = arith.constant 0 : index
      %c0_38 = arith.constant 0 : index
      %46 = vector.load %arg9[%c0_37, %c0_38] : memref<32x128xbf16, #tpu.memory_space<vmem>>, vector<32x128xbf16>
      %cst_39 = arith.constant dense<0.000000e+00> : vector<2x128xf32>
      %47 = tpu.matmul %45, %46, %cst_39 {dimension_numbers = #tpu.dot_dimension_numbers<[1], [0], [0], [1], [0, 0, 1, 1], [], []>} : vector<2x32xbf16>, vector<32x128xbf16>, vector<2x128xf32> -> vector<2x128xf32>
      %48 = arith.addf %44, %47 : vector<2x128xf32>
      %c0_40 = arith.constant 0 : index
      %c0_41 = arith.constant 0 : index
      %49 = vector.load %arg10[%c0_40, %c0_41] : memref<1x128xf32, #tpu.memory_space<vmem>>, vector<1x128xf32>
      %50 = vector.broadcast %49 : vector<1x128xf32> to vector<2x128xf32>
      %51 = arith.addf %48, %50 : vector<2x128xf32>
      %52 = arith.truncf %51 : vector<2x128xf32> to vector<2x128xbf16>
      %c0_42 = arith.constant 0 : index
      %c0_43 = arith.constant 0 : index
      %53 = vector.load %arg11[%c0_42, %c0_43] : memref<128x128xbf16, #tpu.memory_space<vmem>>, vector<128x128xbf16>
      %cst_44 = arith.constant dense<0.000000e+00> : vector<2x128xf32>
      %54 = tpu.matmul %52, %53, %cst_44 {dimension_numbers = #tpu.dot_dimension_numbers<[1], [0], [0], [1], [0, 0, 1, 1], [], []>} : vector<2x128xbf16>, vector<128x128xbf16>, vector<2x128xf32> -> vector<2x128xf32>
      %c0_45 = arith.constant 0 : index
      %c0_46 = arith.constant 0 : index
      %55 = vector.load %arg12[%c0_45, %c0_46] : memref<1x128xf32, #tpu.memory_space<vmem>>, vector<1x128xf32>
      %56 = vector.broadcast %55 : vector<1x128xf32> to vector<2x128xf32>
      %57 = arith.addf %54, %56 : vector<2x128xf32>
      %58 = arith.truncf %57 : vector<2x128xf32> to vector<2x128xbf16>
      %c0_47 = arith.constant 0 : index
      %c0_48 = arith.constant 0 : index
      %59 = vector.load %arg13[%c0_47, %c0_48] : memref<128x128xbf16, #tpu.memory_space<vmem>>, vector<128x128xbf16>
      %cst_49 = arith.constant dense<0.000000e+00> : vector<2x128xf32>
      %60 = tpu.matmul %58, %59, %cst_49 {dimension_numbers = #tpu.dot_dimension_numbers<[1], [0], [0], [1], [0, 0, 1, 1], [], []>} : vector<2x128xbf16>, vector<128x128xbf16>, vector<2x128xf32> -> vector<2x128xf32>
      %c0_50 = arith.constant 0 : index
      %c0_51 = arith.constant 0 : index
      %61 = vector.load %arg14[%c0_50, %c0_51] : memref<1x128xf32, #tpu.memory_space<vmem>>, vector<1x128xf32>
      %62 = vector.broadcast %61 : vector<1x128xf32> to vector<2x128xf32>
      %63 = arith.addf %60, %62 : vector<2x128xf32>
      %c0_52 = arith.constant 0 : index
      %c0_53 = arith.constant 0 : index
      %64 = vector.load %arg15[%c0_52, %c0_53] : memref<2x128xf32, #tpu.memory_space<vmem>>, vector<2x128xf32>
      tpu.vector_store %arg15[%c0_52, %c0_53], %63 {strides = array<i32>} : memref<2x128xf32, #tpu.memory_space<vmem>>, vector<2x128xf32>,
    } else {
    }
    return
  }
  func.func @transform_0(%arg0: i32, %arg1: i32) -> (i32, i32, i32) {
    %c0_i32 = arith.constant 0 : i32
    %c0_i32_0 = arith.constant 0 : i32
    return %arg0, %arg1, %c0_i32 : i32, i32, i32
  }
  func.func @transform_1(%arg0: i32, %arg1: i32) -> (i32, i32, i32) {
    %c0_i32 = arith.constant 0 : i32
    %c0_i32_0 = arith.constant 0 : i32
    return %arg0, %arg1, %c0_i32 : i32, i32, i32
  }
  func.func @transform_2(%arg0: i32, %arg1: i32) -> (i32, i32) {
    %c0_i32 = arith.constant 0 : i32
    %c0_i32_0 = arith.constant 0 : i32
    %c0_i32_1 = arith.constant 0 : i32
    return %c0_i32, %c0_i32_0 : i32, i32
  }
  func.func @transform_3(%arg0: i32, %arg1: i32) -> (i32, i32) {
    %c0_i32 = arith.constant 0 : i32
    %c0_i32_0 = arith.constant 0 : i32
    %c0_i32_1 = arith.constant 0 : i32
    return %c0_i32, %c0_i32_0 : i32, i32
  }
  func.func @transform_4(%arg0: i32, %arg1: i32) -> (i32, i32) {
    %c0_i32 = arith.constant 0 : i32
    %c0_i32_0 = arith.constant 0 : i32
    %c0_i32_1 = arith.constant 0 : i32
    return %c0_i32, %c0_i32_0 : i32, i32
  }
  func.func @transform_5(%arg0: i32, %arg1: i32) -> (i32, i32) {
    %c0_i32 = arith.constant 0 : i32
    %c0_i32_0 = arith.constant 0 : i32
    %c0_i32_1 = arith.constant 0 : i32
    return %c0_i32, %c0_i32_0 : i32, i32
  }
  func.func @transform_6(%arg0: i32, %arg1: i32) -> (i32, i32) {
    %c0_i32 = arith.constant 0 : i32
    %c0_i32_0 = arith.constant 0 : i32
    %c0_i32_1 = arith.constant 0 : i32
    return %c0_i32, %c0_i32_0 : i32, i32
  }
  func.func @transform_7(%arg0: i32, %arg1: i32) -> (i32, i32) {
    %c0_i32 = arith.constant 0 : i32
    %c0_i32_0 = arith.constant 0 : i32
    %c0_i32_1 = arith.constant 0 : i32
    return %c0_i32, %c0_i32_0 : i32, i32
  }
  func.func @transform_8(%arg0: i32, %arg1: i32) -> (i32, i32) {
    %c0_i32 = arith.constant 0 : i32
    %c0_i32_0 = arith.constant 0 : i32
    %c0_i32_1 = arith.constant 0 : i32
    return %c0_i32, %c0_i32_0 : i32, i32
  }
  func.func @transform_9(%arg0: i32, %arg1: i32) -> (i32, i32) {
    %c0_i32 = arith.constant 0 : i32
    %c0_i32_0 = arith.constant 0 : i32
    %c0_i32_1 = arith.constant 0 : i32
    return %c0_i32, %c0_i32_0 : i32, i32
  }
  func.func @transform_10(%arg0: i32, %arg1: i32) -> (i32, i32) {
    %c0_i32 = arith.constant 0 : i32
    %c0_i32_0 = arith.constant 0 : i32
    %c0_i32_1 = arith.constant 0 : i32
    return %c0_i32, %c0_i32_0 : i32, i32
  }
  func.func @transform_11(%arg0: i32, %arg1: i32) -> (i32, i32) {
    %c0_i32 = arith.constant 0 : i32
    %c0_i32_0 = arith.constant 0 : i32
    %c0_i32_1 = arith.constant 0 : i32
    return %c0_i32, %c0_i32_0 : i32, i32
  }
  func.func @transform_12(%arg0: i32, %arg1: i32) -> (i32, i32) {
    %c0_i32 = arith.constant 0 : i32
    %c0_i32_0 = arith.constant 0 : i32
    %c0_i32_1 = arith.constant 0 : i32
    return %c0_i32, %c0_i32_0 : i32, i32
  }
  func.func @transform_13(%arg0: i32, %arg1: i32) -> (i32, i32) {
    %c0_i32 = arith.constant 0 : i32
    %c0_i32_0 = arith.constant 0 : i32
    return %arg0, %c0_i32 : i32, i32
  }
}

module attributes {stable_mosaic.version = 11 : i64} {
  func.func @_snli_kernel(%arg0: i32, %arg1: i32, %arg2: memref<2x8x32xf32, #tpu.memory_space<vmem>>, %arg3: memref<2x8x32xf32, #tpu.memory_space<vmem>>, %arg4: memref<32x32xbf16, #tpu.memory_space<vmem>>, %arg5: memref<1x32xf32, #tpu.memory_space<vmem>>, %arg6: memref<32x128xbf16, #tpu.memory_space<vmem>>, %arg7: memref<32x128xbf16, #tpu.memory_space<vmem>>, %arg8: memref<32x128xbf16, #tpu.memory_space<vmem>>, %arg9: memref<32x128xbf16, #tpu.memory_space<vmem>>, %arg10: memref<1x128xf32, #tpu.memory_space<vmem>>, %arg11: memref<128x128xbf16, #tpu.memory_space<vmem>>, %arg12: memref<1x128xf32, #tpu.memory_space<vmem>>, %arg13: memref<128x128xbf16, #tpu.memory_space<vmem>>, %arg14: memref<1x128xf32, #tpu.memory_space<vmem>>, %arg15: memref<2x128xf32, #tpu.memory_space<vmem>>, %arg16: memref<2x32xf32, #tpu.memory_space<vmem>>, %arg17: memref<2x32xf32, #tpu.memory_space<vmem>>) attributes {dimension_semantics = [#tpu.dimension_semantics<parallel>, #tpu.dimension_semantics<arbitrary>], iteration_bounds = array<i64: 1, 1>, scalar_prefetch = 0 : i64, scratch_operands = 2 : i64, tpu.core_type = #tpu.core_type<tc>, window_params = [{transform_indices = @transform_0, window_bounds = array<i64: 2, 8, 32>}, {transform_indices = @transform_1, window_bounds = array<i64: 2, 8, 32>}, {pipeline_mode = #tpu.pipeline_mode<synchronous>, transform_indices = @transform_2, window_bounds = array<i64: 32, 32>}, {pipeline_mode = #tpu.pipeline_mode<synchronous>, transform_indices = @transform_3, window_bounds = array<i64: 1, 32>}, {pipeline_mode = #tpu.pipeline_mode<synchronous>, transform_indices = @transform_4, window_bounds = array<i64: 32, 128>}, {pipeline_mode = #tpu.pipeline_mode<synchronous>, transform_indices = @transform_5, window_bounds = array<i64: 32, 128>}, {pipeline_mode = #tpu.pipeline_mode<synchronous>, transform_indices = @transform_6, window_bounds = array<i64: 32, 128>}, {pipeline_mode = #tpu.pipeline_mode<synchronous>, transform_indices = @transform_7, window_bounds = array<i64: 32, 128>}, {pipeline_mode = #tpu.pipeline_mode<synchronous>, transform_indices = @transform_8, window_bounds = array<i64: 1, 128>}, {pipeline_mode = #tpu.pipeline_mode<synchronous>, transform_indices = @transform_9, window_bounds = array<i64: 128, 128>}, {pipeline_mode = #tpu.pipeline_mode<synchronous>, transform_indices = @transform_10, window_bounds = array<i64: 1, 128>}, {pipeline_mode = #tpu.pipeline_mode<synchronous>, transform_indices = @transform_11, window_bounds = array<i64: 128, 128>}, {pipeline_mode = #tpu.pipeline_mode<synchronous>, transform_indices = @transform_12, window_bounds = array<i64: 1, 128>}, {transform_indices = @transform_13, window_bounds = array<i64: 2, 128>}]} {
    %c0_i32 = arith.constant 0 : i32
    %0 = arith.cmpi eq, %arg1, %c0_i32 : i32
    %1 = arith.extui %0 : i1 to i32
    %c0_i32_0 = arith.constant 0 : i32
    %2 = arith.cmpi ne, %1, %c0_i32_0 : i32
    scf.if %2 {
      %cst_17 = arith.constant 0.000000e+00 : f32
      %16 = vector.broadcast %cst_17 : f32 to vector<2x32xf32>
      %c0_18 = arith.constant 0 : index
      %c0_19 = arith.constant 0 : index
      %17 = vector.load %arg16[%c0_18, %c0_19] : memref<2x32xf32, #tpu.memory_space<vmem>>, vector<2x32xf32>
      tpu.vector_store %arg16[%c0_18, %c0_19], %16 {strides = array<i32>} : memref<2x32xf32, #tpu.memory_space<vmem>>, vector<2x32xf32>,
      %cst_20 = arith.constant 0.000000e+00 : f32
      %18 = vector.broadcast %cst_20 : f32 to vector<2x32xf32>
      %c0_21 = arith.constant 0 : index
      %c0_22 = arith.constant 0 : index
      %19 = vector.load %arg17[%c0_21, %c0_22] : memref<2x32xf32, #tpu.memory_space<vmem>>, vector<2x32xf32>
      tpu.vector_store %arg17[%c0_21, %c0_22], %18 {strides = array<i32>} : memref<2x32xf32, #tpu.memory_space<vmem>>, vector<2x32xf32>,
    } else {
    }
    %c0 = arith.constant 0 : index
    %c0_1 = arith.constant 0 : index
    %3 = vector.load %arg16[%c0, %c0_1] : memref<2x32xf32, #tpu.memory_space<vmem>>, vector<2x32xf32>
    %c0_2 = arith.constant 0 : index
    %c0_3 = arith.constant 0 : index
    %c0_4 = arith.constant 0 : index
    %4 = vector.load %arg2[%c0_2, %c0_3, %c0_4] : memref<2x8x32xf32, #tpu.memory_space<vmem>>, vector<2x8x32xf32>
    %cst = arith.constant dense<0.000000e+00> : vector<2x32xf32>
    %5 = vector.multi_reduction <add>, %4, %cst [1] : vector<2x8x32xf32> to vector<2x32xf32>
    %6 = arith.addf %3, %5 : vector<2x32xf32>
    %c0_5 = arith.constant 0 : index
    %c0_6 = arith.constant 0 : index
    %7 = vector.load %arg16[%c0_5, %c0_6] : memref<2x32xf32, #tpu.memory_space<vmem>>, vector<2x32xf32>
    tpu.vector_store %arg16[%c0_5, %c0_6], %6 {strides = array<i32>} : memref<2x32xf32, #tpu.memory_space<vmem>>, vector<2x32xf32>,
    %c0_7 = arith.constant 0 : index
    %c0_8 = arith.constant 0 : index
    %8 = vector.load %arg17[%c0_7, %c0_8] : memref<2x32xf32, #tpu.memory_space<vmem>>, vector<2x32xf32>
    %c0_9 = arith.constant 0 : index
    %c0_10 = arith.constant 0 : index
    %c0_11 = arith.constant 0 : index
    %9 = vector.load %arg3[%c0_9, %c0_10, %c0_11] : memref<2x8x32xf32, #tpu.memory_space<vmem>>, vector<2x8x32xf32>
    %cst_12 = arith.constant dense<0.000000e+00> : vector<2x32xf32>
    %10 = vector.multi_reduction <add>, %9, %cst_12 [1] : vector<2x8x32xf32> to vector<2x32xf32>
    %11 = arith.addf %8, %10 : vector<2x32xf32>
    %c0_13 = arith.constant 0 : index
    %c0_14 = arith.constant 0 : index
    %12 = vector.load %arg17[%c0_13, %c0_14] : memref<2x32xf32, #tpu.memory_space<vmem>>, vector<2x32xf32>
    tpu.vector_store %arg17[%c0_13, %c0_14], %11 {strides = array<i32>} : memref<2x32xf32, #tpu.memory_space<vmem>>, vector<2x32xf32>,
    %c0_i32_15 = arith.constant 0 : i32
    %13 = arith.cmpi eq, %arg1, %c0_i32_15 : i32
    %14 = arith.extui %13 : i1 to i32
    %c0_i32_16 = arith.constant 0 : i32
    %15 = arith.cmpi ne, %14, %c0_i32_16 : i32
    scf.if %15 {
      %c0_17 = arith.constant 0 : index
      %c0_18 = arith.constant 0 : index
      %16 = vector.load %arg16[%c0_17, %c0_18] : memref<2x32xf32, #tpu.memory_space<vmem>>, vector<2x32xf32>
      %cst_19 = arith.constant 1.250000e-01 : f32
      %17 = vector.broadcast %cst_19 : f32 to vector<2x32xf32>
      %18 = arith.mulf %16, %17 : vector<2x32xf32>
      %c0_20 = arith.constant 0 : index
      %c0_21 = arith.constant 0 : index
      %19 = vector.load %arg17[%c0_20, %c0_21] : memref<2x32xf32, #tpu.memory_space<vmem>>, vector<2x32xf32>
      %cst_22 = arith.constant 1.250000e-01 : f32
      %20 = vector.broadcast %cst_22 : f32 to vector<2x32xf32>
      %21 = arith.mulf %19, %20 : vector<2x32xf32>
      %22 = tpu.concatenate %18, %21 in 0 : vector<2x32xf32>, vector<2x32xf32> -> vector<4x32xf32>
      %23 = arith.truncf %22 : vector<4x32xf32> to vector<4x32xbf16>
      %c0_23 = arith.constant 0 : index
      %c0_24 = arith.constant 0 : index
      %24 = vector.load %arg4[%c0_23, %c0_24] : memref<32x32xbf16, #tpu.memory_space<vmem>>, vector<32x32xbf16>
      %cst_25 = arith.constant dense<0.000000e+00> : vector<4x32xf32>
      %25 = tpu.matmul %23, %24, %cst_25 {dimension_numbers = #tpu.dot_dimension_numbers<[1], [0], [0], [1], [0, 0, 1, 1], [], []>} : vector<4x32xbf16>, vector<32x32xbf16>, vector<4x32xf32> -> vector<4x32xf32>
      %c0_26 = arith.constant 0 : index
      %c0_27 = arith.constant 0 : index
      %26 = vector.load %arg5[%c0_26, %c0_27] : memref<1x32xf32, #tpu.memory_space<vmem>>, vector<1x32xf32>
      %27 = vector.broadcast %26 : vector<1x32xf32> to vector<4x32xf32>
      %28 = arith.addf %25, %27 : vector<4x32xf32>
      %29 = vector.extract_strided_slice %28 {offsets = [0, 0], sizes = [2, 32], strides = [1, 1]} : vector<4x32xf32> to vector<2x32xf32>
      %30 = vector.extract_strided_slice %28 {offsets = [2, 0], sizes = [2, 32], strides = [1, 1]} : vector<4x32xf32> to vector<2x32xf32>
      %31 = arith.subf %29, %30 : vector<2x32xf32>
      %32 = math.absf %31 : vector<2x32xf32>
      %33 = arith.mulf %29, %30 : vector<2x32xf32>
      %34 = arith.truncf %29 : vector<2x32xf32> to vector<2x32xbf16>
      %c0_28 = arith.constant 0 : index
      %c0_29 = arith.constant 0 : index
      %35 = vector.load %arg6[%c0_28, %c0_29] : memref<32x128xbf16, #tpu.memory_space<vmem>>, vector<32x128xbf16>
      %cst_30 = arith.constant dense<0.000000e+00> : vector<2x128xf32>
      %36 = tpu.matmul %34, %35, %cst_30 {dimension_numbers = #tpu.dot_dimension_numbers<[1], [0], [0], [1], [0, 0, 1, 1], [], []>} : vector<2x32xbf16>, vector<32x128xbf16>, vector<2x128xf32> -> vector<2x128xf32>
      %37 = arith.truncf %30 : vector<2x32xf32> to vector<2x32xbf16>
      %c0_31 = arith.constant 0 : index
      %c0_32 = arith.constant 0 : index
      %38 = vector.load %arg7[%c0_31, %c0_32] : memref<32x128xbf16, #tpu.memory_space<vmem>>, vector<32x128xbf16>
      %cst_33 = arith.constant dense<0.000000e+00> : vector<2x128xf32>
      %39 = tpu.matmul %37, %38, %cst_33 {dimension_numbers = #tpu.dot_dimension_numbers<[1], [0], [0], [1], [0, 0, 1, 1], [], []>} : vector<2x32xbf16>, vector<32x128xbf16>, vector<2x128xf32> -> vector<2x128xf32>
      %40 = arith.addf %36, %39 : vector<2x128xf32>
      %41 = arith.truncf %32 : vector<2x32xf32> to vector<2x32xbf16>
      %c0_34 = arith.constant 0 : index
      %c0_35 = arith.constant 0 : index
      %42 = vector.load %arg8[%c0_34, %c0_35] : memref<32x128xbf16, #tpu.memory_space<vmem>>, vector<32x128xbf16>
      %cst_36 = arith.constant dense<0.000000e+00> : vector<2x128xf32>
      %43 = tpu.matmul %41, %42, %cst_36 {dimension_numbers = #tpu.dot_dimension_numbers<[1], [0], [0], [1], [0, 0, 1, 1], [], []>} : vector<2x32xbf16>, vector<32x128xbf16>, vector<2x128xf32> -> vector<2x128xf32>
      %44 = arith.addf %40, %43 : vector<2x128xf32>
      %45 = arith.truncf %33 : vector<2x32xf32> to vector<2x32xbf16>
      %c0_37 = arith.constant 0 : index
      %c0_38 = arith.constant 0 : index
      %46 = vector.load %arg9[%c0_37, %c0_38] : memref<32x128xbf16, #tpu.memory_space<vmem>>, vector<32x128xbf16>
      %cst_39 = arith.constant dense<0.000000e+00> : vector<2x128xf32>
      %47 = tpu.matmul %45, %46, %cst_39 {dimension_numbers = #tpu.dot_dimension_numbers<[1], [0], [0], [1], [0, 0, 1, 1], [], []>} : vector<2x32xbf16>, vector<32x128xbf16>, vector<2x128xf32> -> vector<2x128xf32>
      %48 = arith.addf %44, %47 : vector<2x128xf32>
      %c0_40 = arith.constant 0 : index
      %c0_41 = arith.constant 0 : index
      %49 = vector.load %arg10[%c0_40, %c0_41] : memref<1x128xf32, #tpu.memory_space<vmem>>, vector<1x128xf32>
      %50 = vector.broadcast %49 : vector<1x128xf32> to vector<2x128xf32>
      %51 = arith.addf %48, %50 : vector<2x128xf32>
      %52 = arith.truncf %51 : vector<2x128xf32> to vector<2x128xbf16>
      %c0_42 = arith.constant 0 : index
      %c0_43 = arith.constant 0 : index
      %53 = vector.load %arg11[%c0_42, %c0_43] : memref<128x128xbf16, #tpu.memory_space<vmem>>, vector<128x128xbf16>
      %cst_44 = arith.constant dense<0.000000e+00> : vector<2x128xf32>
      %54 = tpu.matmul %52, %53, %cst_44 {dimension_numbers = #tpu.dot_dimension_numbers<[1], [0], [0], [1], [0, 0, 1, 1], [], []>} : vector<2x128xbf16>, vector<128x128xbf16>, vector<2x128xf32> -> vector<2x128xf32>
      %c0_45 = arith.constant 0 : index
      %c0_46 = arith.constant 0 : index
      %55 = vector.load %arg12[%c0_45, %c0_46] : memref<1x128xf32, #tpu.memory_space<vmem>>, vector<1x128xf32>
      %56 = vector.broadcast %55 : vector<1x128xf32> to vector<2x128xf32>
      %57 = arith.addf %54, %56 : vector<2x128xf32>
      %58 = arith.truncf %57 : vector<2x128xf32> to vector<2x128xbf16>
      %c0_47 = arith.constant 0 : index
      %c0_48 = arith.constant 0 : index
      %59 = vector.load %arg13[%c0_47, %c0_48] : memref<128x128xbf16, #tpu.memory_space<vmem>>, vector<128x128xbf16>
      %cst_49 = arith.constant dense<0.000000e+00> : vector<2x128xf32>
      %60 = tpu.matmul %58, %59, %cst_49 {dimension_numbers = #tpu.dot_dimension_numbers<[1], [0], [0], [1], [0, 0, 1, 1], [], []>} : vector<2x128xbf16>, vector<128x128xbf16>, vector<2x128xf32> -> vector<2x128xf32>
      %c0_50 = arith.constant 0 : index
      %c0_51 = arith.constant 0 : index
      %61 = vector.load %arg14[%c0_50, %c0_51] : memref<1x128xf32, #tpu.memory_space<vmem>>, vector<1x128xf32>
      %62 = vector.broadcast %61 : vector<1x128xf32> to vector<2x128xf32>
      %63 = arith.addf %60, %62 : vector<2x128xf32>
      %c0_52 = arith.constant 0 : index
      %c0_53 = arith.constant 0 : index
      %64 = vector.load %arg15[%c0_52, %c0_53] : memref<2x128xf32, #tpu.memory_space<vmem>>, vector<2x128xf32>
      tpu.vector_store %arg15[%c0_52, %c0_53], %63 {strides = array<i32>} : memref<2x128xf32, #tpu.memory_space<vmem>>, vector<2x128xf32>,
    } else {
    }
    return
  }
  func.func @transform_0(%arg0: i32, %arg1: i32) -> (i32, i32, i32) {
    %c0_i32 = arith.constant 0 : i32
    %c0_i32_0 = arith.constant 0 : i32
    return %arg0, %arg1, %c0_i32 : i32, i32, i32
  }
  func.func @transform_1(%arg0: i32, %arg1: i32) -> (i32, i32, i32) {
    %c0_i32 = arith.constant 0 : i32
    %c0_i32_0 = arith.constant 0 : i32
    return %arg0, %arg1, %c0_i32 : i32, i32, i32
  }
  func.func @transform_2(%arg0: i32, %arg1: i32) -> (i32, i32) {
    %c0_i32 = arith.constant 0 : i32
    %c0_i32_0 = arith.constant 0 : i32
    %c0_i32_1 = arith.constant 0 : i32
    return %c0_i32, %c0_i32_0 : i32, i32
  }
  func.func @transform_3(%arg0: i32, %arg1: i32) -> (i32, i32) {
    %c0_i32 = arith.constant 0 : i32
    %c0_i32_0 = arith.constant 0 : i32
    %c0_i32_1 = arith.constant 0 : i32
    return %c0_i32, %c0_i32_0 : i32, i32
  }
  func.func @transform_4(%arg0: i32, %arg1: i32) -> (i32, i32) {
    %c0_i32 = arith.constant 0 : i32
    %c0_i32_0 = arith.constant 0 : i32
    %c0_i32_1 = arith.constant 0 : i32
    return %c0_i32, %c0_i32_0 : i32, i32
  }
  func.func @transform_5(%arg0: i32, %arg1: i32) -> (i32, i32) {
    %c0_i32 = arith.constant 0 : i32
    %c0_i32_0 = arith.constant 0 : i32
    %c0_i32_1 = arith.constant 0 : i32
    return %c0_i32, %c0_i32_0 : i32, i32
  }
  func.func @transform_6(%arg0: i32, %arg1: i32) -> (i32, i32) {
    %c0_i32 = arith.constant 0 : i32
    %c0_i32_0 = arith.constant 0 : i32
    %c0_i32_1 = arith.constant 0 : i32
    return %c0_i32, %c0_i32_0 : i32, i32
  }
  func.func @transform_7(%arg0: i32, %arg1: i32) -> (i32, i32) {
    %c0_i32 = arith.constant 0 : i32
    %c0_i32_0 = arith.constant 0 : i32
    %c0_i32_1 = arith.constant 0 : i32
    return %c0_i32, %c0_i32_0 : i32, i32
  }
  func.func @transform_8(%arg0: i32, %arg1: i32) -> (i32, i32) {
    %c0_i32 = arith.constant 0 : i32
    %c0_i32_0 = arith.constant 0 : i32
    %c0_i32_1 = arith.constant 0 : i32
    return %c0_i32, %c0_i32_0 : i32, i32
  }
  func.func @transform_9(%arg0: i32, %arg1: i32) -> (i32, i32) {
    %c0_i32 = arith.constant 0 : i32
    %c0_i32_0 = arith.constant 0 : i32
    %c0_i32_1 = arith.constant 0 : i32
    return %c0_i32, %c0_i32_0 : i32, i32
  }
  func.func @transform_10(%arg0: i32, %arg1: i32) -> (i32, i32) {
    %c0_i32 = arith.constant 0 : i32
    %c0_i32_0 = arith.constant 0 : i32
    %c0_i32_1 = arith.constant 0 : i32
    return %c0_i32, %c0_i32_0 : i32, i32
  }
  func.func @transform_11(%arg0: i32, %arg1: i32) -> (i32, i32) {
    %c0_i32 = arith.constant 0 : i32
    %c0_i32_0 = arith.constant 0 : i32
    %c0_i32_1 = arith.constant 0 : i32
    return %c0_i32, %c0_i32_0 : i32, i32
  }
  func.func @transform_12(%arg0: i32, %arg1: i32) -> (i32, i32) {
    %c0_i32 = arith.constant 0 : i32
    %c0_i32_0 = arith.constant 0 : i32
    %c0_i32_1 = arith.constant 0 : i32
    return %c0_i32, %c0_i32_0 : i32, i32
  }
  func.func @transform_13(%arg0: i32, %arg1: i32) -> (i32, i32) {
    %c0_i32 = arith.constant 0 : i32
    %c0_i32_0 = arith.constant 0 : i32
    return %arg0, %c0_i32 : i32, i32
  }
}

</mosaic_0001>

<bundles_post_ra>
// kernel: tpu_custom_call.1
= control target key start
LH: loop header
LB: loop body
LE: loop exit
PB: predicated region body
PF: predicated region fallthrough
CT: control target
= control target key end

     0   :  { %18 = vsyncpa [#allocation5], 0  ;;  %s1482_s0 = inlined_call_operand.hbm [shape: f32[2,8,32], index: 0, kind: input, shape index: {}]   ;;  %s1483_s1 = inlined_call_operand.hbm [shape: f32[2,8,32], index: 1, kind: input, shape index: {}]   ;;  %s1484_s2 = inlined_call_operand.hbm [shape: bf16[32,32], index: 2, kind: input, shape index: {}]   ;;  %s1485_s3 = inlined_call_operand.vmem [shape: f32[1,32], index: 3, kind: input, shape index: {}]   ;;  %s1486_s4 = inlined_call_operand.hbm [shape: bf16[32,128], index: 4, kind: input, shape index: {}]   ;;  %s1487_s5 = inlined_call_operand.vmem [shape: bf16[32,128], index: 5, kind: input, shape index: {}]   ;;  %s1488_s6 = inlined_call_operand.hbm [shape: bf16[32,128], index: 6, kind: input, shape index: {}]   ;;  %s1489_s7 = inlined_call_operand.hbm [shape: bf16[32,128], index: 7, kind: input, shape index: {}]   ;;  %s1490_s8 = inlined_call_operand.vmem [shape: f32[1,128], index: 8, kind: input, shape index: {}]   ;;  %s1491_s9 = inlined_call_operand.hbm [shape: bf16[128,128], index: 9, kind: input, shape index: {}]   ;;  %s1492_s10 = inlined_call_operand.vmem [shape: f32[1,128], index: 10, kind: input, shape index: {}]   ;;  %s1493_s11 = inlined_call_operand.hbm [shape: bf16[128,128], index: 11, kind: input, shape index: {}]   ;;  %s1494_s12 = inlined_call_operand.vmem [shape: f32[1,128], index: 12, kind: input, shape index: {}]   ;;  %s1495_s13 = inlined_call_operand.hbm [shape: f32[2,128], index: 13, kind: output, shape index: {}]  }
   0x1   :  { %19 = vsyncpa [#allocation8], 0 }
   0x2   :  { %20 = vsyncpa [#allocation11], 0 }
   0x3   :  { %21 = vsyncpa [#allocation14], 0 }
   0x4   :  { %22 = vsyncpa [#allocation17], 0 }
   0x5   :  { %23 = vsyncpa [#allocation6], 0  ;;  %s1190_s25 = smov [#allocation7]   ;;  %s980_s29 = scalar_lea.hbm %s1483_s1, 256 }
   0x6   :  { %s41_s26 = sshll.u32 %s1190_s25, 4  ;;  %p981_p0 = scmp.ne.s32.totalorder %s1483_s1, %s980_s29  ;;  %s42_s26 = int_to_ptr.vmem [resolvable:$true] %s41_s26 }
   0x7   :  { %p984_p1 = scmp.lt.u32.totalorder %s980_s29, %s1483_s1 }
   0x9   :  { %p986_p2 = pnand %p984_p1, %p981_p0 }
   0xb   :  { %989 = shalt.err (!%p986_p2)
}
   0xc   :  { %s990_s17 = scalar_lea.vmem %s42_s26, 256  ;;  %p995_p4 = scmp.lt.s32.totalorder %s42_s26, %s42_s26 }
   0xd   :  { %p991_p3 = scmp.ne.s32.totalorder %s42_s26, %s990_s17  ;;  %p996_p5 = scmp.lt.s32.totalorder %s990_s17, %s990_s17 }
   0xf   :  { %p997_p6 = por %p996_p5, %p995_p4 }
  0x11   :  { %p998_p7 = pnand %p997_p6, %p991_p3 }
  0x13   :  { %1001 = shalt.err (!%p998_p7)
}
  0x14   :  { %s1191_s18 = smov 128   ;;  %s1192_s19 = smov 8  }
  0x15   :  { %47 = dma.hbm_to_vmem [thread:$0]  %s1483_s1, 256, %s42_s26, [#allocation8], %s1191_s18, %s1191_s18, %s1192_s19  }
  0x16   :  { %s1193_s22 = smov [#allocation10]   ;;  %s1194_s24 = smov [#allocation13]  }
  0x17   :  { %s67_s23 = sshll.u32 %s1193_s22, 4  ;;  %s93_s25 = sshll.u32 %s1194_s24, 4  ;;  %s68_s23 = int_to_ptr.vmem [resolvable:$true] %s67_s23  ;;  %s94_s25 = int_to_ptr.vmem [resolvable:$true] %s93_s25 }
  0x18   :  { %s1002_s29 = scalar_lea.hbm %s1486_s4, 256 }
  0x19   :  { %p1003_p8 = scmp.ne.s32.totalorder %s1486_s4, %s1002_s29  ;;  %p1006_p9 = scmp.lt.u32.totalorder %s1002_s29, %s1486_s4 }
  0x1b   :  { %p1008_p10 = pnand %p1006_p9, %p1003_p8 }
  0x1d   :  { %1011 = shalt.err (!%p1008_p10)
}
  0x1e   :  { %s1012_s1 = scalar_lea.vmem %s68_s23, 256  ;;  %p1017_p12 = scmp.lt.s32.totalorder %s68_s23, %s68_s23 }
  0x1f   :  { %p1013_p11 = scmp.ne.s32.totalorder %s68_s23, %s1012_s1  ;;  %p1018_p13 = scmp.lt.s32.totalorder %s1012_s1, %s1012_s1 }
  0x21   :  { %p1019_p0 = por %p1018_p13, %p1017_p12 }
  0x23   :  { %p1020_p1 = pnand %p1019_p0, %p1013_p11 }
  0x25   :  { %1023 = shalt.err (!%p1020_p1)
}
  0x26   :  { %s1195_s26 = smov 64   ;;  %s1196_s17 = smov 4  }
  0x27   :  { %73 = dma.hbm_to_vmem [thread:$0]  %s1486_s4, 256, %s68_s23, [#allocation11], %s1195_s26, %s1195_s26, %s1196_s17  }
  0x28   :  { %s1024_s27 = scalar_lea.hbm %s1489_s7, 256 }
  0x29   :  { %p1025_p2 = scmp.ne.s32.totalorder %s1489_s7, %s1024_s27  ;;  %p1028_p3 = scmp.lt.u32.totalorder %s1024_s27, %s1489_s7 }
  0x2b   :  { %p1030_p4 = pnand %p1028_p3, %p1025_p2 }
  0x2d   :  { %1033 = shalt.err (!%p1030_p4)
}
  0x2e   :  { %s1034_s15 = scalar_lea.vmem %s94_s25, 256  ;;  %p1039_p6 = scmp.lt.s32.totalorder %s94_s25, %s94_s25 }
  0x2f   :  { %p1035_p5 = scmp.ne.s32.totalorder %s94_s25, %s1034_s15  ;;  %p1040_p7 = scmp.lt.s32.totalorder %s1034_s15, %s1034_s15 }
  0x31   :  { %p1041_p8 = por %p1040_p7, %p1039_p6 }
  0x33   :  { %p1042_p9 = pnand %p1041_p8, %p1035_p5 }
  0x35   :  { %1045 = shalt.err (!%p1042_p9)
}
  0x36   :  { %99 = dma.hbm_to_vmem [thread:$0]  %s1489_s7, 256, %s94_s25, [#allocation14], %s1195_s26, %s1195_s26, %s1196_s17  }
  0x37   :  { %s1197_s16 = smov [#allocation4]   ;;  %s1198_s20 = smov [#allocation9]  }
  0x38   :  { %s29_s1 = sshll.u32 %s1197_s16, 4  ;;  %s53_s21 = sshll.u32 %s1198_s20, 4  ;;  %s30_s1 = int_to_ptr.vmem [resolvable:$true] %s29_s1  ;;  %s54_s21 = int_to_ptr.vmem [resolvable:$true] %s53_s21 }
  0x39   :  { %s1046_s27 = scalar_lea.hbm %s1482_s0, 256 }
  0x3a   :  { %p1047_p10 = scmp.ne.s32.totalorder %s1482_s0, %s1046_s27  ;;  %p1050_p11 = scmp.lt.u32.totalorder %s1046_s27, %s1482_s0 }
  0x3c   :  { %p1052_p12 = pnand %p1050_p11, %p1047_p10 }
  0x3e   :  { %1055 = shalt.err (!%p1052_p12)
}
  0x3f   :  { %s1056_s7 = scalar_lea.vmem %s30_s1, 256  ;;  %p1061_p0 = scmp.lt.s32.totalorder %s30_s1, %s30_s1 }
  0x40   :  { %p1057_p13 = scmp.ne.s32.totalorder %s30_s1, %s1056_s7  ;;  %p1062_p1 = scmp.lt.s32.totalorder %s1056_s7, %s1056_s7 }
  0x42   :  { %p1063_p2 = por %p1062_p1, %p1061_p0 }
  0x44   :  { %p1064_p3 = pnand %p1063_p2, %p1057_p13 }
  0x46   :  { %1067 = shalt.err (!%p1064_p3)
}
  0x47   :  { %35 = dma.hbm_to_vmem [thread:$0]  %s1482_s0, 256, %s30_s1, [#allocation5], %s1191_s18, %s1191_s18, %s1192_s19  }
  0x48   :  { %s1068_s16 = scalar_lea.hbm %s1484_s2, 256 }
  0x49   :  { %p1069_p4 = scmp.ne.s32.totalorder %s1484_s2, %s1068_s16  ;;  %p1072_p5 = scmp.lt.u32.totalorder %s1068_s16, %s1484_s2 }
  0x4b   :  { %p1074_p6 = pnand %p1072_p5, %p1069_p4 }
  0x4d   :  { %1077 = shalt.err (!%p1074_p6)
}
  0x4e   :  { %s1078_s28 = scalar_lea.vmem %s54_s21, 256  ;;  %p1083_p8 = scmp.lt.s32.totalorder %s54_s21, %s54_s21 }
  0x4f   :  { %p1079_p7 = scmp.ne.s32.totalorder %s54_s21, %s1078_s28  ;;  %p1084_p9 = scmp.lt.s32.totalorder %s1078_s28, %s1078_s28 }
  0x51   :  { %p1085_p10 = por %p1084_p9, %p1083_p8 }
  0x53   :  { %p1086_p11 = pnand %p1085_p10, %p1079_p7 }
  0x55   :  { %1089 = shalt.err (!%p1086_p11)
}
  0x56   :  { %59 = dma.hbm_to_vmem [thread:$0]  %s1484_s2, 256, %s54_s21, [#allocation8], %s1195_s26, %s1195_s26, %s1196_s17  }
  0x57   :  { %s1199_s19 = smov [#allocation12]   ;;  %s1200_s29 = smov [#allocation15]  }
  0x58   :  { %s81_s1 = sshll.u32 %s1199_s19, 4  ;;  %s107_s30 = sshll.u32 %s1200_s29, 4  ;;  %s82_s1 = int_to_ptr.vmem [resolvable:$true] %s81_s1  ;;  %s108_s30 = int_to_ptr.vmem [resolvable:$true] %s107_s30 }
  0x59   :  { %s1090_s25 = scalar_lea.hbm %s1488_s6, 256 }
  0x5a   :  { %p1091_p12 = scmp.ne.s32.totalorder %s1488_s6, %s1090_s25  ;;  %p1094_p13 = scmp.lt.u32.totalorder %s1090_s25, %s1488_s6 }
  0x5c   :  { %p1096_p0 = pnand %p1094_p13, %p1091_p12 }
  0x5e   :  { %1099 = shalt.err (!%p1096_p0)
}
  0x5f   :  { %s1100_s2 = scalar_lea.vmem %s82_s1, 256  ;;  %p1105_p2 = scmp.lt.s32.totalorder %s82_s1, %s82_s1 }
  0x60   :  { %p1101_p1 = scmp.ne.s32.totalorder %s82_s1, %s1100_s2  ;;  %p1106_p3 = scmp.lt.s32.totalorder %s1100_s2, %s1100_s2 }
  0x62   :  { %p1107_p4 = por %p1106_p3, %p1105_p2 }
  0x64   :  { %p1108_p5 = pnand %p1107_p4, %p1101_p1 }
  0x66   :  { %1111 = shalt.err (!%p1108_p5)
}
  0x67   :  { %87 = dma.hbm_to_vmem [thread:$0]  %s1488_s6, 256, %s82_s1, [#allocation11], %s1195_s26, %s1195_s26, %s1196_s17  }
  0x68   :  { %s1112_s27 = scalar_lea.hbm %s1491_s9, 1024 }
  0x69   :  { %p1113_p6 = scmp.ne.s32.totalorder %s1491_s9, %s1112_s27  ;;  %p1116_p7 = scmp.lt.u32.totalorder %s1112_s27, %s1491_s9 }
  0x6b   :  { %p1118_p8 = pnand %p1116_p7, %p1113_p6 }
  0x6d   :  { %1121 = shalt.err (!%p1118_p8)
}
  0x6e   :  { %s1122_s29 = scalar_lea.vmem %s108_s30, 1024  ;;  %p1127_p10 = scmp.lt.s32.totalorder %s108_s30, %s108_s30 }
  0x6f   :  { %p1123_p9 = scmp.ne.s32.totalorder %s108_s30, %s1122_s29  ;;  %p1128_p11 = scmp.lt.s32.totalorder %s1122_s29, %s1122_s29 }
  0x71   :  { %p1129_p12 = por %p1128_p11, %p1127_p10 }
  0x73   :  { %p1130_p13 = pnand %p1129_p12, %p1123_p9 }
  0x75   :  { %1133 = shalt.err (!%p1130_p13)
}
  0x76   :  { %113 = dma.hbm_to_vmem [thread:$0]  %s1491_s9, 1024, %s108_s30, [#allocation14], %s1195_s26, %s1195_s26, %s1196_s17  }
  0x77   :  { %s1201_s14 = smov [#allocation16]   ;;  %s1134_s4 = scalar_lea.hbm %s1493_s11, 1024 }
  0x78   :  { %s121_s7 = sshll.u32 %s1201_s14, 4  ;;  %p1135_p0 = scmp.ne.s32.totalorder %s1493_s11, %s1134_s4  ;;  %s122_s7 = int_to_ptr.vmem [resolvable:$true] %s121_s7 }
  0x79   :  { %p1138_p1 = scmp.lt.u32.totalorder %s1134_s4, %s1493_s11 }
  0x7b   :  { %p1140_p2 = pnand %p1138_p1, %p1135_p0 }
  0x7d   :  { %1143 = shalt.err (!%p1140_p2)
}
  0x7e   :  { %s1144_s20 = scalar_lea.vmem %s122_s7, 1024  ;;  %p1149_p4 = scmp.lt.s32.totalorder %s122_s7, %s122_s7 }
  0x7f   :  { %p1145_p3 = scmp.ne.s32.totalorder %s122_s7, %s1144_s20  ;;  %p1150_p5 = scmp.lt.s32.totalorder %s1144_s20, %s1144_s20 }
  0x81   :  { %p1151_p6 = por %p1150_p5, %p1149_p4 }
  0x83   :  { %p1152_p7 = pnand %p1151_p6, %p1145_p3 }
  0x85   :  { %1155 = shalt.err (!%p1152_p7)
}
  0x86   :  { %127 = dma.hbm_to_vmem [thread:$0]  %s1493_s11, 1024, %s122_s7, [#allocation17], %s1195_s26, %s1195_s26, %s1196_s17  }
  0x87   :  { %1178 = dma.done.wait [#allocation5], 256  }
  0x88   :  { %1179 = vsyncadd [#allocation5], 4294967040 }
  0x89   :  { %1180 = dma.done.wait [#allocation8], 512  }
  0x8a   :  { %1181 = vsyncadd [#allocation8], 4294966784 }
  0x8b   :  { %1182 = dma.done.wait [#allocation11], 512  }
  0x8c   :  { %1183 = vsyncadd [#allocation11], 4294966784 }
  0x8d   :  { %1184 = dma.done.wait [#allocation14], 1280  }
  0x8e   :  { %1185 = vsyncadd [#allocation14], 4294966016 }
  0x8f   :  { %1186 = dma.done.wait [#allocation17], 1024  }
  0x90   :  { %1187 = vsyncadd [#allocation17], 4294966272  ;;  %vm159_vm0 = vcmask 254976   ;;  %v1202_v0 = vmov 0.0   ;;  %vm1203_vm1 = vmmov 0   ;;  %v954_v1 = vld [vmem:[#allocation9] sm:$0xff]  }
  0x91   :  { %859 = vmatprep.subr.bf16.mxu0 %v1202_v0  ;;  %863 = vmatprep.mubr.msk.bf16.mxu0 %vm1203_vm1, %v1202_v0  ;;  %160 = vst.msk [vmem:[#allocation2] sm:$0x3] %vm159_vm0, %v1202_v0  ;;  %161 = vst.msk [vmem:[#allocation3] sm:$0x3] %vm159_vm0, %v1202_v0  ;;  %vm165_vm2 = vcmask 261120   ;;  %v955_v2 = vld [vmem:[#allocation9 + $0x8] sm:$0xff]  }
  0x92   :  { %867 = vmatprep.subr.bf16.mxu1 %v1202_v0  ;;  %871 = vmatprep.mubr.msk.bf16.mxu1 %vm1203_vm1, %v1202_v0  ;;  %v163_v3 = vld [vmem:[#allocation4] sm:$0xff]  ;;  %v164_v4 = vld [vmem:[#allocation4 + $0x8] sm:$0xff]  ;;  %v189_v7 = vld [vmem:[#allocation7] sm:$0xff]  ;;  %vm182_vm3 = vcmask 1041409   ;;  %vm221_vm4 = vcmask 1041408   ;;  %s1204_s19 = smov [#allocation18]  }
  0x93   :  { %860 = vmatpush3.bf16.msra.mxu0 %v954_v1  ;;  %v166_v5 = vsel %vm165_vm2, %v163_v3, 0.0  ;;  %v173_v6 = vsel %vm165_vm2, %v164_v4, 0.0  ;;  %v190_v8 = vld [vmem:[#allocation7 + $0x8] sm:$0xff]  ;;  %v191_v11 = vsel %vm165_vm2, %v189_v7, 0.0  ;;  %v956_v48 = vld [vmem:[#allocation10] sm:$0xff]   ;;  %v959_v51 = vld [vmem:[%s1487_s5 + $0x8] sm:$0xff]  }
  0x94   :  { %861 = vmatprep.subr.bf16.mxu0 %v1202_v0  ;;  %v167_v9 = vrot.slane %v166_v5, 4  ;;  %v174_v10 = vrot.slane %v173_v6, 4  ;;  %v198_v12 = vsel %vm165_vm2, %v190_v8, 0.0  ;;  %v192_v13 = vrot.slane %v191_v11, 4  ;;  %v957_v15 = vld [vmem:[%s1487_s5] sm:$0xff]   ;;  %v960_v57 = vld [vmem:[#allocation13] sm:$0xff]  }
  0x95   :  { %v199_v14 = vrot.slane %v198_v12, 4  ;;  %868 = vmatpush3.bf16.msra.mxu1 %v957_v15  ;;  %v958_v50 = vld [vmem:[#allocation10 + $0x8] sm:$0xff]   ;;  %v961_v61 = vld [vmem:[#allocation12] sm:$0xff]   ;;  %v963_v3 = vld [vmem:[#allocation12 + $0x8] sm:$0xff]   ;;  %s778_s29 = sshll.u32 %s1204_s19, 4  ;;  %s779_s29 = int_to_ptr.vmem [resolvable:$true] %s778_s29 }
  0x96   :  { %v168_v16 = vadd.f32 %v167_v9, %v166_v5  ;;  %v175_v17 = vadd.f32 %v174_v10, %v173_v6  ;;  %v193_v18 = vadd.f32 %v192_v13, %v191_v11  ;;  %869 = vmatprep.subr.bf16.mxu1 %v1202_v0  ;;  %v791_v52 = vld [vmem:[%s1485_s3] ss:$0 sm:$0xff]  ;;  %v964_v6 = vld [vmem:[#allocation15] sm:$0xff]   ;;  %v965_v8 = vld [vmem:[#allocation15 + $0x8] sm:$0xff]   ;;  %p1161_p9 = scmp.lt.s32.totalorder %s779_s29, %s779_s29 }
  0x97   :  { %862 = vmatpush3.bf16.msra.mxu0 %v955_v2  ;;  %v200_v19 = vadd.f32 %v199_v14, %v198_v12  ;;  %v962_v1 = vld [vmem:[#allocation13 + $0x8] sm:$0xff]   ;;  %v966_v9 = vld [vmem:[#allocation15 + $0x10] sm:$0xff]   ;;  %v968_v11 = vld [vmem:[#allocation15 + $0x20] sm:$0xff]  }
  0x98   :  { %875 = vmatprep.subr.bf16.mxu0 %v1202_v0  ;;  %v169_v20 = vrot.slane %v168_v16, 2  ;;  %v176_v21 = vrot.slane %v175_v17, 2  ;;  %v194_v22 = vrot.slane %v193_v18, 2  ;;  %v162_v28 = vld [vmem:[#allocation2] sm:$0x3]  ;;  %v969_v12 = vld [vmem:[#allocation15 + $0x28] sm:$0xff]  }
  0x99   :  { %v201_v23 = vrot.slane %v200_v19, 2  ;;  %v188_v31 = vld [vmem:[#allocation3] sm:$0x3]  ;;  %870 = vmatpush3.bf16.msra.mxu1 %v959_v51  ;;  %v970_v13 = vld [vmem:[#allocation15 + $0x30] sm:$0xff]   ;;  %v972_v15 = vld [vmem:[#allocation16] sm:$0xff]  }
  0x9a   :  { %v170_v24 = vadd.f32 %v169_v20, %v168_v16  ;;  %v177_v25 = vadd.f32 %v176_v21, %v175_v17  ;;  %v195_v26 = vadd.f32 %v194_v22, %v193_v18  ;;  %883 = vmatprep.subr.bf16.mxu1 %v1202_v0  ;;  %v967_v10 = vld [vmem:[#allocation15 + $0x18] sm:$0xff]   ;;  %v973_v16 = vld [vmem:[#allocation16 + $0x8] sm:$0xff]   ;;  %v974_v17 = vld [vmem:[#allocation16 + $0x10] sm:$0xff]  }
  0x9b   :  { %v202_v27 = vadd.f32 %v201_v23, %v200_v19  ;;  %v971_v14 = vld [vmem:[#allocation15 + $0x38] sm:$0xff]   ;;  %v976_v19 = vld [vmem:[#allocation16 + $0x20] sm:$0xff]   ;;  %v977_v20 = vld [vmem:[#allocation16 + $0x28] sm:$0xff]  }
  0x9c   :  { %v171_v29 = vrot.slane %v170_v24, 1  ;;  %v178_v30 = vrot.slane %v177_v25, 1  ;;  %v196_v32 = vrot.slane %v195_v26, 1  ;;  %v975_v18 = vld [vmem:[#allocation16 + $0x18] sm:$0xff]   ;;  %v978_v21 = vld [vmem:[#allocation16 + $0x30] sm:$0xff]  }
  0x9d   :  { %v203_v33 = vrot.slane %v202_v27, 1  ;;  %v817_v51 = vld [vmem:[%s1494_s12] ss:$0 sm:$0xff] }
  0x9e   :  { %v172_v34 = vadd.f32 %v171_v29, %v170_v24  ;;  %v179_v35 = vadd.f32 %v178_v30, %v177_v25  ;;  %v197_v36 = vadd.f32 %v196_v32, %v195_v26 }
  0x9f   :  { %v204_v37 = vadd.f32 %v203_v33, %v202_v27 }
  0xa0   :  { %v183_v38 = vsel %vm182_vm3, %v179_v35, %v172_v34 }
  0xa1   :  { %v185_v39 = vadd.f32 %v183_v38, %v162_v28  ;;  %v207_v40 = vsel %vm182_vm3, %v204_v37, %v197_v36 }
  0xa2   :  { %v209_v41 = vadd.f32 %v207_v40, %v188_v31 }
  0xa3   :  { %187 = vst.msk [vmem:[#allocation2] sm:$0x3] %vm159_vm0, %v185_v39 }
  0xa4   :  { %210 = vst.msk [vmem:[#allocation3] sm:$0x3] %vm159_vm0, %v209_v41 }
  0xaa   :  { %v214_v42 = vld [vmem:[#allocation2] sm:$0x3] }
  0xab   :  { %v216_v43 = vld [vmem:[#allocation3] sm:$0x3]  ;;  %v215_v44 = vmul.f32 0.125, %v214_v42 }
  0xac   :  { %v217_v45 = vmul.f32 0.125, %v216_v43  ;;  %v979_v43 = vld [vmem:[#allocation16 + $0x38] sm:$0xff]  }
  0xae   :  { %v219_v46 = vrot.slane %v217_v45, 6 }
  0xb0   :  { %v222_v47 = vsel %vm221_vm4, %v215_v44, %v219_v46  ;;  %v808_v44 = vld [vmem:[%s1492_s10] ss:$0 sm:$0xff]  ;;  %s1156_s10 = scalar_lea.vmem %s779_s29, 32 }
  0xb1   :  { %v223_v49 = vpack.c.bf16 %v222_v47, %v222_v47  ;;  %p1157_p8 = scmp.ne.s32.totalorder %s779_s29, %s1156_s10  ;;  %p1162_p10 = scmp.lt.s32.totalorder %s1156_s10, %s1156_s10 }
  0xb3   :  { %864 = vmatmul.mubr.msk.bf16.vlgmr.msra.gmra.mrb[0].mxu0 %vm165_vm2, %v223_v49  ;;  %p1163_p11 = por %p1162_p10, %p1161_p9 }
  0xb4   :  { %876 = vmatpush3.bf16.msra.mxu0 %v956_v48  ;;  %879 = vmatprep.mubr.msk.bf16.mxu0 %vm1203_vm1, %v1202_v0 }
  0xb5   :  { %877 = vmatprep.subr.bf16.mxu0 %v1202_v0  ;;  %p1164_p12 = pnand %p1163_p11, %p1157_p8 }
  0xb8   :  { %878 = vmatpush3.bf16.msra.mxu0 %v958_v50 }
  0xb9   :  { %891 = vmatprep.subr.bf16.mxu0 %v1202_v0 }
 0x186   :  { %v284_v53 = vpop.f32.mrb[0].mxu0 }
 0x187   :  { %v285_v54 = vadd.f32 %v791_v52, %v284_v53  ;;  %v865_v55 = vpop.f32.mrb[1].mxu0 }
 0x188   :  { %v287_v56 = vpop.f32.mrb[2].mxu0 }
 0x189   :  { %v291_v58 = vrot.slane %v285_v54, 2  ;;  %v296_v59 = vpack.c.bf16 %v285_v54, %v285_v54  ;;  %v866_v60 = vpop.f32.mrb[3].mxu0 }
 0x18b   :  { %v293_v62 = vsub.f32 %v285_v54, %v291_v58  ;;  %880 = vmatmul.mubr.msk.bf16.vlgmr.msra.gmra.mrb[4].mxu0 %vm165_vm2, %v296_v59  ;;  %v306_v63 = vrot.slane %v296_v59, 1  ;;  %v295_v2 = vmul.f32 %v291_v58, %v285_v54 }
 0x18c   :  { %892 = vmatpush3.bf16.msra.mxu0 %v960_v57  ;;  %895 = vmatprep.mubr.msk.bf16.mxu0 %vm1203_vm1, %v1202_v0 }
 0x18d   :  { %872 = vmatmul.mubr.msk.bf16.vlgmr.msra.gmra.mrb[0].mxu1 %vm165_vm2, %v306_v63  ;;  %893 = vmatprep.subr.bf16.mxu0 %v1202_v0  ;;  %v294_v4 = vand.u32 2147483647, %v293_v62  ;;  %v478_v5 = vpack.c.bf16 %v295_v2, %v295_v2 }
 0x18e   :  { %884 = vmatpush3.bf16.msra.mxu1 %v961_v61  ;;  %887 = vmatprep.mubr.msk.bf16.mxu1 %vm1203_vm1, %v1202_v0 }
 0x18f   :  { %885 = vmatprep.subr.bf16.mxu1 %v1202_v0  ;;  %v417_v7 = vpack.c.bf16 %v294_v4, %v294_v4 }
 0x190   :  { %894 = vmatpush3.bf16.msra.mxu0 %v962_v1 }
 0x191   :  { %919 = vmatprep.subr.bf16.mxu0 %v1202_v0 }
 0x192   :  { %886 = vmatpush3.bf16.msra.mxu1 %v963_v3 }
 0x193   :  { %896 = vmatmul.mubr.msk.bf16.vlgmr.msra.gmra.mrb[8].mxu0 %vm165_vm2, %v478_v5  ;;  %899 = vmatprep.subr.bf16.mxu1 %v1202_v0 }
 0x194   :  { %935 = vmatprep.mubr.msk.bf16.mxu0 %vm1203_vm1, %v1202_v0  ;;  %920 = vmatpush3.bf16.msra.mxu0 %v972_v15 }
 0x195   :  { %888 = vmatmul.mubr.msk.bf16.vlgmr.msra.gmra.mrb[4].mxu1 %vm165_vm2, %v417_v7  ;;  %921 = vmatprep.subr.bf16.mxu0 %v1202_v0 }
 0x196   :  { %900 = vmatpush3.bf16.msra.mxu1 %v964_v6  ;;  %915 = vmatprep.mubr.msk.bf16.mxu1 %vm1203_vm1, %v1202_v0 }
 0x197   :  { %901 = vmatprep.subr.bf16.mxu1 %v1202_v0 }
 0x198   :  { %922 = vmatpush3.bf16.msra.mxu0 %v973_v16 }
 0x199   :  { %923 = vmatprep.subr.bf16.mxu0 %v1202_v0 }
 0x19a   :  { %902 = vmatpush3.bf16.msra.mxu1 %v965_v8 }
 0x19b   :  { %903 = vmatprep.subr.bf16.mxu1 %v1202_v0 }
 0x19c   :  { %924 = vmatpush3.bf16.msra.mxu0 %v974_v17 }
 0x19d   :  { %925 = vmatprep.subr.bf16.mxu0 %v1202_v0 }
 0x19e   :  { %904 = vmatpush3.bf16.msra.mxu1 %v966_v9 }
 0x19f   :  { %905 = vmatprep.subr.bf16.mxu1 %v1202_v0 }
 0x1a0   :  { %926 = vmatpush3.bf16.msra.mxu0 %v975_v18 }
 0x1a1   :  { %927 = vmatprep.subr.bf16.mxu0 %v1202_v0 }
 0x1a2   :  { %906 = vmatpush3.bf16.msra.mxu1 %v967_v10 }
 0x1a3   :  { %907 = vmatprep.subr.bf16.mxu1 %v1202_v0 }
 0x1a4   :  { %928 = vmatpush3.bf16.msra.mxu0 %v976_v19 }
 0x1a5   :  { %929 = vmatprep.subr.bf16.mxu0 %v1202_v0 }
 0x1a6   :  { %908 = vmatpush3.bf16.msra.mxu1 %v968_v11 }
 0x1a7   :  { %909 = vmatprep.subr.bf16.mxu1 %v1202_v0 }
 0x1a8   :  { %930 = vmatpush3.bf16.msra.mxu0 %v977_v20 }
 0x1a9   :  { %931 = vmatprep.subr.bf16.mxu0 %v1202_v0 }
 0x1aa   :  { %910 = vmatpush3.bf16.msra.mxu1 %v969_v12 }
 0x1ab   :  { %911 = vmatprep.subr.bf16.mxu1 %v1202_v0 }
 0x1ac   :  { %932 = vmatpush3.bf16.msra.mxu0 %v978_v21 }
 0x1ad   :  { %933 = vmatprep.subr.bf16.mxu0 %v1202_v0 }
 0x1ae   :  { %912 = vmatpush3.bf16.msra.mxu1 %v970_v13 }
 0x1af   :  { %913 = vmatprep.subr.bf16.mxu1 %v1202_v0  ;;  %v807_v0 = vld [vmem:[%s1490_s8] ss:$0 sm:$0xff] }
 0x1b0   :  { %934 = vmatpush3.bf16.msra.mxu0 %v979_v43 }
 0x1b2   :  { %914 = vmatpush3.bf16.msra.mxu1 %v971_v14 }
 0x25e   :  { %v411_v22 = vpop.f32.mrb[4].mxu0 }
 0x25f   :  { %v881_v23 = vpop.f32.mrb[5].mxu0 }
 0x260   :  { %v356_v24 = vpop.f32.mrb[0].mxu1  ;;  %v414_v25 = vpop.f32.mrb[6].mxu0 }
 0x261   :  { %v412_v26 = vadd.f32 %v411_v22, %v356_v24  ;;  %v873_v27 = vpop.f32.mrb[1].mxu1  ;;  %v882_v28 = vpop.f32.mrb[7].mxu0 }
 0x262   :  { %v359_v29 = vpop.f32.mrb[2].mxu1 }
 0x263   :  { %v874_v30 = vpop.f32.mrb[3].mxu1 }
 0x266   :  { %v532_v31 = vpop.f32.mrb[8].mxu0 }
 0x267   :  { %v897_v32 = vpop.f32.mrb[9].mxu0 }
 0x268   :  { %v471_v33 = vpop.f32.mrb[4].mxu1  ;;  %v535_v34 = vpop.f32.mrb[10].mxu0 }
 0x269   :  { %v477_v35 = vadd.f32 %v471_v33, %v412_v26  ;;  %v889_v36 = vpop.f32.mrb[5].mxu1  ;;  %v898_v37 = vpop.f32.mrb[11].mxu0 }
 0x26a   :  { %v474_v38 = vpop.f32.mrb[6].mxu1 }
 0x26b   :  { %v538_v39 = vadd.f32 %v532_v31, %v477_v35  ;;  %v890_v40 = vpop.f32.mrb[7].mxu1 }
 0x26d   :  { %v546_v41 = vadd.f32 %v807_v0, %v538_v39 }
 0x26f   :  { %v547_v42 = vpack.c.bf16 %v546_v41, %v546_v41 }
 0x271   :  { %916 = vmatmul.mubr.bf16.vlgmr.msra.gmra.mrb[8].mxu1 %v547_v42 }
 0x344   :  { %v653_v45 = vpop.f32.mrb[8].mxu1 }
 0x345   :  { %v654_v46 = vadd.f32 %v808_v44, %v653_v45  ;;  %v917_v47 = vpop.f32.mrb[9].mxu1 }
 0x346   :  { %v656_v48 = vpop.f32.mrb[10].mxu1 }
 0x347   :  { %v659_v49 = vpack.c.bf16 %v654_v46, %v654_v46  ;;  %v918_v50 = vpop.f32.mrb[11].mxu1 }
 0x349   :  { %936 = vmatmul.mubr.bf16.vlgmr.msra.gmra.mrb[12].mxu0 %v659_v49 }
 0x41c   :  { %v765_v52 = vpop.f32.mrb[12].mxu0 }
 0x41d   :  { %v766_v53 = vadd.f32 %v817_v51, %v765_v52  ;;  %v937_v54 = vpop.f32.mrb[13].mxu0 }
 0x41e   :  { %v768_v55 = vpop.f32.mrb[14].mxu0 }
 0x41f   :  { %771 = vst [vmem:[#allocation18] sm:$0x3] %v766_v53  ;;  %v938_v56 = vpop.f32.mrb[15].mxu0 }
 0x420   :  { %1167 = shalt.err (!%p1164_p12)
}
 0x421   :  { %s1168_s12 = scalar_lea.hbm %s1495_s13, 32 }
 0x422   :  { %p1169_p13 = scmp.ne.s32.totalorder %s1495_s13, %s1168_s12  ;;  %p1172_p0 = scmp.lt.u32.totalorder %s1168_s12, %s1495_s13 }
 0x424   :  { %p1174_p1 = pnand %p1172_p0, %p1169_p13 }
 0x426   :  { %1177 = shalt.err (!%p1174_p1)
}
 0x427   :  { %781 = dma.vmem_to_hbm [thread:$0]  %s779_s29, 32, %s1495_s13, [#allocation6]  }
 0x428   :  { %1188 = dma.done.wait [#allocation6], 32  }
 0x429   :  { %1189 = vsyncadd [#allocation6], 4294967264 }
 0x42a   :  { %785 = vsyncpa [#allocation5], 1 }
 0x42b   :  { %786 = vsyncpa [#allocation8], 1 }
 0x42c   :  { %787 = vsyncpa [#allocation11], 1 }
 0x42d   :  { %788 = vsyncpa [#allocation14], 1 }
 0x42e   :  { %789 = vsyncpa [#allocation17], 1 }
 0x42f   :  { %790 = vsyncpa [#allocation6], 1 }

// kernel: tpu_custom_call.1
= control target key start
LH: loop header
LB: loop body
LE: loop exit
PB: predicated region body
PF: predicated region fallthrough
CT: control target
= control target key end

     0   :  { %18 = vsyncpa [#allocation5], 0  ;;  %s1482_s0 = inlined_call_operand.hbm [shape: f32[2,8,32], index: 0, kind: input, shape index: {}]   ;;  %s1483_s1 = inlined_call_operand.hbm [shape: f32[2,8,32], index: 1, kind: input, shape index: {}]   ;;  %s1484_s2 = inlined_call_operand.hbm [shape: bf16[32,32], index: 2, kind: input, shape index: {}]   ;;  %s1485_s3 = inlined_call_operand.vmem [shape: f32[1,32], index: 3, kind: input, shape index: {}]   ;;  %s1486_s4 = inlined_call_operand.hbm [shape: bf16[32,128], index: 4, kind: input, shape index: {}]   ;;  %s1487_s5 = inlined_call_operand.vmem [shape: bf16[32,128], index: 5, kind: input, shape index: {}]   ;;  %s1488_s6 = inlined_call_operand.hbm [shape: bf16[32,128], index: 6, kind: input, shape index: {}]   ;;  %s1489_s7 = inlined_call_operand.hbm [shape: bf16[32,128], index: 7, kind: input, shape index: {}]   ;;  %s1490_s8 = inlined_call_operand.vmem [shape: f32[1,128], index: 8, kind: input, shape index: {}]   ;;  %s1491_s9 = inlined_call_operand.hbm [shape: bf16[128,128], index: 9, kind: input, shape index: {}]   ;;  %s1492_s10 = inlined_call_operand.vmem [shape: f32[1,128], index: 10, kind: input, shape index: {}]   ;;  %s1493_s11 = inlined_call_operand.hbm [shape: bf16[128,128], index: 11, kind: input, shape index: {}]   ;;  %s1494_s12 = inlined_call_operand.vmem [shape: f32[1,128], index: 12, kind: input, shape index: {}]   ;;  %s1495_s13 = inlined_call_operand.hbm [shape: f32[2,128], index: 13, kind: output, shape index: {}]  }
   0x1   :  { %19 = vsyncpa [#allocation8], 0 }
   0x2   :  { %20 = vsyncpa [#allocation11], 0 }
   0x3   :  { %21 = vsyncpa [#allocation14], 0 }
   0x4   :  { %22 = vsyncpa [#allocation17], 0 }
   0x5   :  { %23 = vsyncpa [#allocation6], 0  ;;  %s1190_s25 = smov [#allocation7]   ;;  %s980_s29 = scalar_lea.hbm %s1483_s1, 256 }
   0x6   :  { %s41_s26 = sshll.u32 %s1190_s25, 4  ;;  %p981_p0 = scmp.ne.s32.totalorder %s1483_s1, %s980_s29  ;;  %s42_s26 = int_to_ptr.vmem [resolvable:$true] %s41_s26 }
   0x7   :  { %p984_p1 = scmp.lt.u32.totalorder %s980_s29, %s1483_s1 }
   0x9   :  { %p986_p2 = pnand %p984_p1, %p981_p0 }
   0xb   :  { %989 = shalt.err (!%p986_p2)
}
   0xc   :  { %s990_s17 = scalar_lea.vmem %s42_s26, 256  ;;  %p995_p4 = scmp.lt.s32.totalorder %s42_s26, %s42_s26 }
   0xd   :  { %p991_p3 = scmp.ne.s32.totalorder %s42_s26, %s990_s17  ;;  %p996_p5 = scmp.lt.s32.totalorder %s990_s17, %s990_s17 }
   0xf   :  { %p997_p6 = por %p996_p5, %p995_p4 }
  0x11   :  { %p998_p7 = pnand %p997_p6, %p991_p3 }
  0x13   :  { %1001 = shalt.err (!%p998_p7)
}
  0x14   :  { %s1191_s18 = smov 128   ;;  %s1192_s19 = smov 8  }
  0x15   :  { %47 = dma.hbm_to_vmem [thread:$0]  %s1483_s1, 256, %s42_s26, [#allocation8], %s1191_s18, %s1191_s18, %s1192_s19  }
  0x16   :  { %s1193_s22 = smov [#allocation10]   ;;  %s1194_s24 = smov [#allocation13]  }
  0x17   :  { %s67_s23 = sshll.u32 %s1193_s22, 4  ;;  %s93_s25 = sshll.u32 %s1194_s24, 4  ;;  %s68_s23 = int_to_ptr.vmem [resolvable:$true] %s67_s23  ;;  %s94_s25 = int_to_ptr.vmem [resolvable:$true] %s93_s25 }
  0x18   :  { %s1002_s29 = scalar_lea.hbm %s1486_s4, 256 }
  0x19   :  { %p1003_p8 = scmp.ne.s32.totalorder %s1486_s4, %s1002_s29  ;;  %p1006_p9 = scmp.lt.u32.totalorder %s1002_s29, %s1486_s4 }
  0x1b   :  { %p1008_p10 = pnand %p1006_p9, %p1003_p8 }
  0x1d   :  { %1011 = shalt.err (!%p1008_p10)
}
  0x1e   :  { %s1012_s1 = scalar_lea.vmem %s68_s23, 256  ;;  %p1017_p12 = scmp.lt.s32.totalorder %s68_s23, %s68_s23 }
  0x1f   :  { %p1013_p11 = scmp.ne.s32.totalorder %s68_s23, %s1012_s1  ;;  %p1018_p13 = scmp.lt.s32.totalorder %s1012_s1, %s1012_s1 }
  0x21   :  { %p1019_p0 = por %p1018_p13, %p1017_p12 }
  0x23   :  { %p1020_p1 = pnand %p1019_p0, %p1013_p11 }
  0x25   :  { %1023 = shalt.err (!%p1020_p1)
}
  0x26   :  { %s1195_s26 = smov 64   ;;  %s1196_s17 = smov 4  }
  0x27   :  { %73 = dma.hbm_to_vmem [thread:$0]  %s1486_s4, 256, %s68_s23, [#allocation11], %s1195_s26, %s1195_s26, %s1196_s17  }
  0x28   :  { %s1024_s27 = scalar_lea.hbm %s1489_s7, 256 }
  0x29   :  { %p1025_p2 = scmp.ne.s32.totalorder %s1489_s7, %s1024_s27  ;;  %p1028_p3 = scmp.lt.u32.totalorder %s1024_s27, %s1489_s7 }
  0x2b   :  { %p1030_p4 = pnand %p1028_p3, %p1025_p2 }
  0x2d   :  { %1033 = shalt.err (!%p1030_p4)
}
  0x2e   :  { %s1034_s15 = scalar_lea.vmem %s94_s25, 256  ;;  %p1039_p6 = scmp.lt.s32.totalorder %s94_s25, %s94_s25 }
  0x2f   :  { %p1035_p5 = scmp.ne.s32.totalorder %s94_s25, %s1034_s15  ;;  %p1040_p7 = scmp.lt.s32.totalorder %s1034_s15, %s1034_s15 }
  0x31   :  { %p1041_p8 = por %p1040_p7, %p1039_p6 }
  0x33   :  { %p1042_p9 = pnand %p1041_p8, %p1035_p5 }
  0x35   :  { %1045 = shalt.err (!%p1042_p9)
}
  0x36   :  { %99 = dma.hbm_to_vmem [thread:$0]  %s1489_s7, 256, %s94_s25, [#allocation14], %s1195_s26, %s1195_s26, %s1196_s17  }
  0x37   :  { %s1197_s16 = smov [#allocation4]   ;;  %s1198_s20 = smov [#allocation9]  }
  0x38   :  { %s29_s1 = sshll.u32 %s1197_s16, 4  ;;  %s53_s21 = sshll.u32 %s1198_s20, 4  ;;  %s30_s1 = int_to_ptr.vmem [resolvable:$true] %s29_s1  ;;  %s54_s21 = int_to_ptr.vmem [resolvable:$true] %s53_s21 }
  0x39   :  { %s1046_s27 = scalar_lea.hbm %s1482_s0, 256 }
  0x3a   :  { %p1047_p10 = scmp.ne.s32.totalorder %s1482_s0, %s1046_s27  ;;  %p1050_p11 = scmp.lt.u32.totalorder %s1046_s27, %s1482_s0 }
  0x3c   :  { %p1052_p12 = pnand %p1050_p11, %p1047_p10 }
  0x3e   :  { %1055 = shalt.err (!%p1052_p12)
}
  0x3f   :  { %s1056_s7 = scalar_lea.vmem %s30_s1, 256  ;;  %p1061_p0 = scmp.lt.s32.totalorder %s30_s1, %s30_s1 }
  0x40   :  { %p1057_p13 = scmp.ne.s32.totalorder %s30_s1, %s1056_s7  ;;  %p1062_p1 = scmp.lt.s32.totalorder %s1056_s7, %s1056_s7 }
  0x42   :  { %p1063_p2 = por %p1062_p1, %p1061_p0 }
  0x44   :  { %p1064_p3 = pnand %p1063_p2, %p1057_p13 }
  0x46   :  { %1067 = shalt.err (!%p1064_p3)
}
  0x47   :  { %35 = dma.hbm_to_vmem [thread:$0]  %s1482_s0, 256, %s30_s1, [#allocation5], %s1191_s18, %s1191_s18, %s1192_s19  }
  0x48   :  { %s1068_s16 = scalar_lea.hbm %s1484_s2, 256 }
  0x49   :  { %p1069_p4 = scmp.ne.s32.totalorder %s1484_s2, %s1068_s16  ;;  %p1072_p5 = scmp.lt.u32.totalorder %s1068_s16, %s1484_s2 }
  0x4b   :  { %p1074_p6 = pnand %p1072_p5, %p1069_p4 }
  0x4d   :  { %1077 = shalt.err (!%p1074_p6)
}
  0x4e   :  { %s1078_s28 = scalar_lea.vmem %s54_s21, 256  ;;  %p1083_p8 = scmp.lt.s32.totalorder %s54_s21, %s54_s21 }
  0x4f   :  { %p1079_p7 = scmp.ne.s32.totalorder %s54_s21, %s1078_s28  ;;  %p1084_p9 = scmp.lt.s32.totalorder %s1078_s28, %s1078_s28 }
  0x51   :  { %p1085_p10 = por %p1084_p9, %p1083_p8 }
  0x53   :  { %p1086_p11 = pnand %p1085_p10, %p1079_p7 }
  0x55   :  { %1089 = shalt.err (!%p1086_p11)
}
  0x56   :  { %59 = dma.hbm_to_vmem [thread:$0]  %s1484_s2, 256, %s54_s21, [#allocation8], %s1195_s26, %s1195_s26, %s1196_s17  }
  0x57   :  { %s1199_s19 = smov [#allocation12]   ;;  %s1200_s29 = smov [#allocation15]  }
  0x58   :  { %s81_s1 = sshll.u32 %s1199_s19, 4  ;;  %s107_s30 = sshll.u32 %s1200_s29, 4  ;;  %s82_s1 = int_to_ptr.vmem [resolvable:$true] %s81_s1  ;;  %s108_s30 = int_to_ptr.vmem [resolvable:$true] %s107_s30 }
  0x59   :  { %s1090_s25 = scalar_lea.hbm %s1488_s6, 256 }
  0x5a   :  { %p1091_p12 = scmp.ne.s32.totalorder %s1488_s6, %s1090_s25  ;;  %p1094_p13 = scmp.lt.u32.totalorder %s1090_s25, %s1488_s6 }
  0x5c   :  { %p1096_p0 = pnand %p1094_p13, %p1091_p12 }
  0x5e   :  { %1099 = shalt.err (!%p1096_p0)
}
  0x5f   :  { %s1100_s2 = scalar_lea.vmem %s82_s1, 256  ;;  %p1105_p2 = scmp.lt.s32.totalorder %s82_s1, %s82_s1 }
  0x60   :  { %p1101_p1 = scmp.ne.s32.totalorder %s82_s1, %s1100_s2  ;;  %p1106_p3 = scmp.lt.s32.totalorder %s1100_s2, %s1100_s2 }
  0x62   :  { %p1107_p4 = por %p1106_p3, %p1105_p2 }
  0x64   :  { %p1108_p5 = pnand %p1107_p4, %p1101_p1 }
  0x66   :  { %1111 = shalt.err (!%p1108_p5)
}
  0x67   :  { %87 = dma.hbm_to_vmem [thread:$0]  %s1488_s6, 256, %s82_s1, [#allocation11], %s1195_s26, %s1195_s26, %s1196_s17  }
  0x68   :  { %s1112_s27 = scalar_lea.hbm %s1491_s9, 1024 }
  0x69   :  { %p1113_p6 = scmp.ne.s32.totalorder %s1491_s9, %s1112_s27  ;;  %p1116_p7 = scmp.lt.u32.totalorder %s1112_s27, %s1491_s9 }
  0x6b   :  { %p1118_p8 = pnand %p1116_p7, %p1113_p6 }
  0x6d   :  { %1121 = shalt.err (!%p1118_p8)
}
  0x6e   :  { %s1122_s29 = scalar_lea.vmem %s108_s30, 1024  ;;  %p1127_p10 = scmp.lt.s32.totalorder %s108_s30, %s108_s30 }
  0x6f   :  { %p1123_p9 = scmp.ne.s32.totalorder %s108_s30, %s1122_s29  ;;  %p1128_p11 = scmp.lt.s32.totalorder %s1122_s29, %s1122_s29 }
  0x71   :  { %p1129_p12 = por %p1128_p11, %p1127_p10 }
  0x73   :  { %p1130_p13 = pnand %p1129_p12, %p1123_p9 }
  0x75   :  { %1133 = shalt.err (!%p1130_p13)
}
  0x76   :  { %113 = dma.hbm_to_vmem [thread:$0]  %s1491_s9, 1024, %s108_s30, [#allocation14], %s1195_s26, %s1195_s26, %s1196_s17  }
  0x77   :  { %s1201_s14 = smov [#allocation16]   ;;  %s1134_s4 = scalar_lea.hbm %s1493_s11, 1024 }
  0x78   :  { %s121_s7 = sshll.u32 %s1201_s14, 4  ;;  %p1135_p0 = scmp.ne.s32.totalorder %s1493_s11, %s1134_s4  ;;  %s122_s7 = int_to_ptr.vmem [resolvable:$true] %s121_s7 }
  0x79   :  { %p1138_p1 = scmp.lt.u32.totalorder %s1134_s4, %s1493_s11 }
  0x7b   :  { %p1140_p2 = pnand %p1138_p1, %p1135_p0 }
  0x7d   :  { %1143 = shalt.err (!%p1140_p2)
}
  0x7e   :  { %s1144_s20 = scalar_lea.vmem %s122_s7, 1024  ;;  %p1149_p4 = scmp.lt.s32.totalorder %s122_s7, %s122_s7 }
  0x7f   :  { %p1145_p3 = scmp.ne.s32.totalorder %s122_s7, %s1144_s20  ;;  %p1150_p5 = scmp.lt.s32.totalorder %s1144_s20, %s1144_s20 }
  0x81   :  { %p1151_p6 = por %p1150_p5, %p1149_p4 }
  0x83   :  { %p1152_p7 = pnand %p1151_p6, %p1145_p3 }
  0x85   :  { %1155 = shalt.err (!%p1152_p7)
}
  0x86   :  { %127 = dma.hbm_to_vmem [thread:$0]  %s1493_s11, 1024, %s122_s7, [#allocation17], %s1195_s26, %s1195_s26, %s1196_s17  }
  0x87   :  { %1178 = dma.done.wait [#allocation5], 256  }
  0x88   :  { %1179 = vsyncadd [#allocation5], 4294967040 }
  0x89   :  { %1180 = dma.done.wait [#allocation8], 512  }
  0x8a   :  { %1181 = vsyncadd [#allocation8], 4294966784 }
  0x8b   :  { %1182 = dma.done.wait [#allocation11], 512  }
  0x8c   :  { %1183 = vsyncadd [#allocation11], 4294966784 }
  0x8d   :  { %1184 = dma.done.wait [#allocation14], 1280  }
  0x8e   :  { %1185 = vsyncadd [#allocation14], 4294966016 }
  0x8f   :  { %1186 = dma.done.wait [#allocation17], 1024  }
  0x90   :  { %1187 = vsyncadd [#allocation17], 4294966272  ;;  %vm159_vm0 = vcmask 254976   ;;  %v1202_v0 = vmov 0.0   ;;  %vm1203_vm1 = vmmov 0   ;;  %v954_v1 = vld [vmem:[#allocation9] sm:$0xff]  }
  0x91   :  { %859 = vmatprep.subr.bf16.mxu0 %v1202_v0  ;;  %863 = vmatprep.mubr.msk.bf16.mxu0 %vm1203_vm1, %v1202_v0  ;;  %160 = vst.msk [vmem:[#allocation2] sm:$0x3] %vm159_vm0, %v1202_v0  ;;  %161 = vst.msk [vmem:[#allocation3] sm:$0x3] %vm159_vm0, %v1202_v0  ;;  %vm165_vm2 = vcmask 261120   ;;  %v955_v2 = vld [vmem:[#allocation9 + $0x8] sm:$0xff]  }
  0x92   :  { %867 = vmatprep.subr.bf16.mxu1 %v1202_v0  ;;  %871 = vmatprep.mubr.msk.bf16.mxu1 %vm1203_vm1, %v1202_v0  ;;  %v163_v3 = vld [vmem:[#allocation4] sm:$0xff]  ;;  %v164_v4 = vld [vmem:[#allocation4 + $0x8] sm:$0xff]  ;;  %v189_v7 = vld [vmem:[#allocation7] sm:$0xff]  ;;  %vm182_vm3 = vcmask 1041409   ;;  %vm221_vm4 = vcmask 1041408   ;;  %s1204_s19 = smov [#allocation18]  }
  0x93   :  { %860 = vmatpush3.bf16.msra.mxu0 %v954_v1  ;;  %v166_v5 = vsel %vm165_vm2, %v163_v3, 0.0  ;;  %v173_v6 = vsel %vm165_vm2, %v164_v4, 0.0  ;;  %v190_v8 = vld [vmem:[#allocation7 + $0x8] sm:$0xff]  ;;  %v191_v11 = vsel %vm165_vm2, %v189_v7, 0.0  ;;  %v956_v48 = vld [vmem:[#allocation10] sm:$0xff]   ;;  %v959_v51 = vld [vmem:[%s1487_s5 + $0x8] sm:$0xff]  }
  0x94   :  { %861 = vmatprep.subr.bf16.mxu0 %v1202_v0  ;;  %v167_v9 = vrot.slane %v166_v5, 4  ;;  %v174_v10 = vrot.slane %v173_v6, 4  ;;  %v198_v12 = vsel %vm165_vm2, %v190_v8, 0.0  ;;  %v192_v13 = vrot.slane %v191_v11, 4  ;;  %v957_v15 = vld [vmem:[%s1487_s5] sm:$0xff]   ;;  %v960_v57 = vld [vmem:[#allocation13] sm:$0xff]  }
  0x95   :  { %v199_v14 = vrot.slane %v198_v12, 4  ;;  %868 = vmatpush3.bf16.msra.mxu1 %v957_v15  ;;  %v958_v50 = vld [vmem:[#allocation10 + $0x8] sm:$0xff]   ;;  %v961_v61 = vld [vmem:[#allocation12] sm:$0xff]   ;;  %v963_v3 = vld [vmem:[#allocation12 + $0x8] sm:$0xff]   ;;  %s778_s29 = sshll.u32 %s1204_s19, 4  ;;  %s779_s29 = int_to_ptr.vmem [resolvable:$true] %s778_s29 }
  0x96   :  { %v168_v16 = vadd.f32 %v167_v9, %v166_v5  ;;  %v175_v17 = vadd.f32 %v174_v10, %v173_v6  ;;  %v193_v18 = vadd.f32 %v192_v13, %v191_v11  ;;  %869 = vmatprep.subr.bf16.mxu1 %v1202_v0  ;;  %v791_v52 = vld [vmem:[%s1485_s3] ss:$0 sm:$0xff]  ;;  %v964_v6 = vld [vmem:[#allocation15] sm:$0xff]   ;;  %v965_v8 = vld [vmem:[#allocation15 + $0x8] sm:$0xff]   ;;  %p1161_p9 = scmp.lt.s32.totalorder %s779_s29, %s779_s29 }
  0x97   :  { %862 = vmatpush3.bf16.msra.mxu0 %v955_v2  ;;  %v200_v19 = vadd.f32 %v199_v14, %v198_v12  ;;  %v962_v1 = vld [vmem:[#allocation13 + $0x8] sm:$0xff]   ;;  %v966_v9 = vld [vmem:[#allocation15 + $0x10] sm:$0xff]   ;;  %v968_v11 = vld [vmem:[#allocation15 + $0x20] sm:$0xff]  }
  0x98   :  { %875 = vmatprep.subr.bf16.mxu0 %v1202_v0  ;;  %v169_v20 = vrot.slane %v168_v16, 2  ;;  %v176_v21 = vrot.slane %v175_v17, 2  ;;  %v194_v22 = vrot.slane %v193_v18, 2  ;;  %v162_v28 = vld [vmem:[#allocation2] sm:$0x3]  ;;  %v969_v12 = vld [vmem:[#allocation15 + $0x28] sm:$0xff]  }
  0x99   :  { %v201_v23 = vrot.slane %v200_v19, 2  ;;  %v188_v31 = vld [vmem:[#allocation3] sm:$0x3]  ;;  %870 = vmatpush3.bf16.msra.mxu1 %v959_v51  ;;  %v970_v13 = vld [vmem:[#allocation15 + $0x30] sm:$0xff]   ;;  %v972_v15 = vld [vmem:[#allocation16] sm:$0xff]  }
  0x9a   :  { %v170_v24 = vadd.f32 %v169_v20, %v168_v16  ;;  %v177_v25 = vadd.f32 %v176_v21, %v175_v17  ;;  %v195_v26 = vadd.f32 %v194_v22, %v193_v18  ;;  %883 = vmatprep.subr.bf16.mxu1 %v1202_v0  ;;  %v967_v10 = vld [vmem:[#allocation15 + $0x18] sm:$0xff]   ;;  %v973_v16 = vld [vmem:[#allocation16 + $0x8] sm:$0xff]   ;;  %v974_v17 = vld [vmem:[#allocation16 + $0x10] sm:$0xff]  }
  0x9b   :  { %v202_v27 = vadd.f32 %v201_v23, %v200_v19  ;;  %v971_v14 = vld [vmem:[#allocation15 + $0x38] sm:$0xff]   ;;  %v976_v19 = vld [vmem:[#allocation16 + $0x20] sm:$0xff]   ;;  %v977_v20 = vld [vmem:[#allocation16 + $0x28] sm:$0xff]  }
  0x9c   :  { %v171_v29 = vrot.slane %v170_v24, 1  ;;  %v178_v30 = vrot.slane %v177_v25, 1  ;;  %v196_v32 = vrot.slane %v195_v26, 1  ;;  %v975_v18 = vld [vmem:[#allocation16 + $0x18] sm:$0xff]   ;;  %v978_v21 = vld [vmem:[#allocation16 + $0x30] sm:$0xff]  }
  0x9d   :  { %v203_v33 = vrot.slane %v202_v27, 1  ;;  %v817_v51 = vld [vmem:[%s1494_s12] ss:$0 sm:$0xff] }
  0x9e   :  { %v172_v34 = vadd.f32 %v171_v29, %v170_v24  ;;  %v179_v35 = vadd.f32 %v178_v30, %v177_v25  ;;  %v197_v36 = vadd.f32 %v196_v32, %v195_v26 }
  0x9f   :  { %v204_v37 = vadd.f32 %v203_v33, %v202_v27 }
  0xa0   :  { %v183_v38 = vsel %vm182_vm3, %v179_v35, %v172_v34 }
  0xa1   :  { %v185_v39 = vadd.f32 %v183_v38, %v162_v28  ;;  %v207_v40 = vsel %vm182_vm3, %v204_v37, %v197_v36 }
  0xa2   :  { %v209_v41 = vadd.f32 %v207_v40, %v188_v31 }
  0xa3   :  { %187 = vst.msk [vmem:[#allocation2] sm:$0x3] %vm159_vm0, %v185_v39 }
  0xa4   :  { %210 = vst.msk [vmem:[#allocation3] sm:$0x3] %vm159_vm0, %v209_v41 }
  0xaa   :  { %v214_v42 = vld [vmem:[#allocation2] sm:$0x3] }
  0xab   :  { %v216_v43 = vld [vmem:[#allocation3] sm:$0x3]  ;;  %v215_v44 = vmul.f32 0.125, %v214_v42 }
  0xac   :  { %v217_v45 = vmul.f32 0.125, %v216_v43  ;;  %v979_v43 = vld [vmem:[#allocation16 + $0x38] sm:$0xff]  }
  0xae   :  { %v219_v46 = vrot.slane %v217_v45, 6 }
  0xb0   :  { %v222_v47 = vsel %vm221_vm4, %v215_v44, %v219_v46  ;;  %v808_v44 = vld [vmem:[%s1492_s10] ss:$0 sm:$0xff]  ;;  %s1156_s10 = scalar_lea.vmem %s779_s29, 32 }
  0xb1   :  { %v223_v49 = vpack.c.bf16 %v222_v47, %v222_v47  ;;  %p1157_p8 = scmp.ne.s32.totalorder %s779_s29, %s1156_s10  ;;  %p1162_p10 = scmp.lt.s32.totalorder %s1156_s10, %s1156_s10 }
  0xb3   :  { %864 = vmatmul.mubr.msk.bf16.vlgmr.msra.gmra.mrb[0].mxu0 %vm165_vm2, %v223_v49  ;;  %p1163_p11 = por %p1162_p10, %p1161_p9 }
  0xb4   :  { %876 = vmatpush3.bf16.msra.mxu0 %v956_v48  ;;  %879 = vmatprep.mubr.msk.bf16.mxu0 %vm1203_vm1, %v1202_v0 }
  0xb5   :  { %877 = vmatprep.subr.bf16.mxu0 %v1202_v0  ;;  %p1164_p12 = pnand %p1163_p11, %p1157_p8 }
  0xb8   :  { %878 = vmatpush3.bf16.msra.mxu0 %v958_v50 }
  0xb9   :  { %891 = vmatprep.subr.bf16.mxu0 %v1202_v0 }
 0x186   :  { %v284_v53 = vpop.f32.mrb[0].mxu0 }
 0x187   :  { %v285_v54 = vadd.f32 %v791_v52, %v284_v53  ;;  %v865_v55 = vpop.f32.mrb[1].mxu0 }
 0x188   :  { %v287_v56 = vpop.f32.mrb[2].mxu0 }
 0x189   :  { %v291_v58 = vrot.slane %v285_v54, 2  ;;  %v296_v59 = vpack.c.bf16 %v285_v54, %v285_v54  ;;  %v866_v60 = vpop.f32.mrb[3].mxu0 }
 0x18b   :  { %v293_v62 = vsub.f32 %v285_v54, %v291_v58  ;;  %880 = vmatmul.mubr.msk.bf16.vlgmr.msra.gmra.mrb[4].mxu0 %vm165_vm2, %v296_v59  ;;  %v306_v63 = vrot.slane %v296_v59, 1  ;;  %v295_v2 = vmul.f32 %v291_v58, %v285_v54 }
 0x18c   :  { %892 = vmatpush3.bf16.msra.mxu0 %v960_v57  ;;  %895 = vmatprep.mubr.msk.bf16.mxu0 %vm1203_vm1, %v1202_v0 }
 0x18d   :  { %872 = vmatmul.mubr.msk.bf16.vlgmr.msra.gmra.mrb[0].mxu1 %vm165_vm2, %v306_v63  ;;  %893 = vmatprep.subr.bf16.mxu0 %v1202_v0  ;;  %v294_v4 = vand.u32 2147483647, %v293_v62  ;;  %v478_v5 = vpack.c.bf16 %v295_v2, %v295_v2 }
 0x18e   :  { %884 = vmatpush3.bf16.msra.mxu1 %v961_v61  ;;  %887 = vmatprep.mubr.msk.bf16.mxu1 %vm1203_vm1, %v1202_v0 }
 0x18f   :  { %885 = vmatprep.subr.bf16.mxu1 %v1202_v0  ;;  %v417_v7 = vpack.c.bf16 %v294_v4, %v294_v4 }
 0x190   :  { %894 = vmatpush3.bf16.msra.mxu0 %v962_v1 }
 0x191   :  { %919 = vmatprep.subr.bf16.mxu0 %v1202_v0 }
 0x192   :  { %886 = vmatpush3.bf16.msra.mxu1 %v963_v3 }
 0x193   :  { %896 = vmatmul.mubr.msk.bf16.vlgmr.msra.gmra.mrb[8].mxu0 %vm165_vm2, %v478_v5  ;;  %899 = vmatprep.subr.bf16.mxu1 %v1202_v0 }
 0x194   :  { %935 = vmatprep.mubr.msk.bf16.mxu0 %vm1203_vm1, %v1202_v0  ;;  %920 = vmatpush3.bf16.msra.mxu0 %v972_v15 }
 0x195   :  { %888 = vmatmul.mubr.msk.bf16.vlgmr.msra.gmra.mrb[4].mxu1 %vm165_vm2, %v417_v7  ;;  %921 = vmatprep.subr.bf16.mxu0 %v1202_v0 }
 0x196   :  { %900 = vmatpush3.bf16.msra.mxu1 %v964_v6  ;;  %915 = vmatprep.mubr.msk.bf16.mxu1 %vm1203_vm1, %v1202_v0 }
 0x197   :  { %901 = vmatprep.subr.bf16.mxu1 %v1202_v0 }
 0x198   :  { %922 = vmatpush3.bf16.msra.mxu0 %v973_v16 }
 0x199   :  { %923 = vmatprep.subr.bf16.mxu0 %v1202_v0 }
 0x19a   :  { %902 = vmatpush3.bf16.msra.mxu1 %v965_v8 }
 0x19b   :  { %903 = vmatprep.subr.bf16.mxu1 %v1202_v0 }
 0x19c   :  { %924 = vmatpush3.bf16.msra.mxu0 %v974_v17 }
 0x19d   :  { %925 = vmatprep.subr.bf16.mxu0 %v1202_v0 }
 0x19e   :  { %904 = vmatpush3.bf16.msra.mxu1 %v966_v9 }
 0x19f   :  { %905 = vmatprep.subr.bf16.mxu1 %v1202_v0 }
 0x1a0   :  { %926 = vmatpush3.bf16.msra.mxu0 %v975_v18 }
 0x1a1   :  { %927 = vmatprep.subr.bf16.mxu0 %v1202_v0 }
 0x1a2   :  { %906 = vmatpush3.bf16.msra.mxu1 %v967_v10 }
 0x1a3   :  { %907 = vmatprep.subr.bf16.mxu1 %v1202_v0 }
 0x1a4   :  { %928 = vmatpush3.bf16.msra.mxu0 %v976_v19 }
 0x1a5   :  { %929 = vmatprep.subr.bf16.mxu0 %v1202_v0 }
 0x1a6   :  { %908 = vmatpush3.bf16.msra.mxu1 %v968_v11 }
 0x1a7   :  { %909 = vmatprep.subr.bf16.mxu1 %v1202_v0 }
 0x1a8   :  { %930 = vmatpush3.bf16.msra.mxu0 %v977_v20 }
 0x1a9   :  { %931 = vmatprep.subr.bf16.mxu0 %v1202_v0 }
 0x1aa   :  { %910 = vmatpush3.bf16.msra.mxu1 %v969_v12 }
 0x1ab   :  { %911 = vmatprep.subr.bf16.mxu1 %v1202_v0 }
 0x1ac   :  { %932 = vmatpush3.bf16.msra.mxu0 %v978_v21 }
 0x1ad   :  { %933 = vmatprep.subr.bf16.mxu0 %v1202_v0 }
 0x1ae   :  { %912 = vmatpush3.bf16.msra.mxu1 %v970_v13 }
 0x1af   :  { %913 = vmatprep.subr.bf16.mxu1 %v1202_v0  ;;  %v807_v0 = vld [vmem:[%s1490_s8] ss:$0 sm:$0xff] }
 0x1b0   :  { %934 = vmatpush3.bf16.msra.mxu0 %v979_v43 }
 0x1b2   :  { %914 = vmatpush3.bf16.msra.mxu1 %v971_v14 }
 0x25e   :  { %v411_v22 = vpop.f32.mrb[4].mxu0 }
 0x25f   :  { %v881_v23 = vpop.f32.mrb[5].mxu0 }
 0x260   :  { %v356_v24 = vpop.f32.mrb[0].mxu1  ;;  %v414_v25 = vpop.f32.mrb[6].mxu0 }
 0x261   :  { %v412_v26 = vadd.f32 %v411_v22, %v356_v24  ;;  %v873_v27 = vpop.f32.mrb[1].mxu1  ;;  %v882_v28 = vpop.f32.mrb[7].mxu0 }
 0x262   :  { %v359_v29 = vpop.f32.mrb[2].mxu1 }
 0x263   :  { %v874_v30 = vpop.f32.mrb[3].mxu1 }
 0x266   :  { %v532_v31 = vpop.f32.mrb[8].mxu0 }
 0x267   :  { %v897_v32 = vpop.f32.mrb[9].mxu0 }
 0x268   :  { %v471_v33 = vpop.f32.mrb[4].mxu1  ;;  %v535_v34 = vpop.f32.mrb[10].mxu0 }
 0x269   :  { %v477_v35 = vadd.f32 %v471_v33, %v412_v26  ;;  %v889_v36 = vpop.f32.mrb[5].mxu1  ;;  %v898_v37 = vpop.f32.mrb[11].mxu0 }
 0x26a   :  { %v474_v38 = vpop.f32.mrb[6].mxu1 }
 0x26b   :  { %v538_v39 = vadd.f32 %v532_v31, %v477_v35  ;;  %v890_v40 = vpop.f32.mrb[7].mxu1 }
 0x26d   :  { %v546_v41 = vadd.f32 %v807_v0, %v538_v39 }
 0x26f   :  { %v547_v42 = vpack.c.bf16 %v546_v41, %v546_v41 }
 0x271   :  { %916 = vmatmul.mubr.bf16.vlgmr.msra.gmra.mrb[8].mxu1 %v547_v42 }
 0x344   :  { %v653_v45 = vpop.f32.mrb[8].mxu1 }
 0x345   :  { %v654_v46 = vadd.f32 %v808_v44, %v653_v45  ;;  %v917_v47 = vpop.f32.mrb[9].mxu1 }
 0x346   :  { %v656_v48 = vpop.f32.mrb[10].mxu1 }
 0x347   :  { %v659_v49 = vpack.c.bf16 %v654_v46, %v654_v46  ;;  %v918_v50 = vpop.f32.mrb[11].mxu1 }
 0x349   :  { %936 = vmatmul.mubr.bf16.vlgmr.msra.gmra.mrb[12].mxu0 %v659_v49 }
 0x41c   :  { %v765_v52 = vpop.f32.mrb[12].mxu0 }
 0x41d   :  { %v766_v53 = vadd.f32 %v817_v51, %v765_v52  ;;  %v937_v54 = vpop.f32.mrb[13].mxu0 }
 0x41e   :  { %v768_v55 = vpop.f32.mrb[14].mxu0 }
 0x41f   :  { %771 = vst [vmem:[#allocation18] sm:$0x3] %v766_v53  ;;  %v938_v56 = vpop.f32.mrb[15].mxu0 }
 0x420   :  { %1167 = shalt.err (!%p1164_p12)
}
 0x421   :  { %s1168_s12 = scalar_lea.hbm %s1495_s13, 32 }
 0x422   :  { %p1169_p13 = scmp.ne.s32.totalorder %s1495_s13, %s1168_s12  ;;  %p1172_p0 = scmp.lt.u32.totalorder %s1168_s12, %s1495_s13 }
 0x424   :  { %p1174_p1 = pnand %p1172_p0, %p1169_p13 }
 0x426   :  { %1177 = shalt.err (!%p1174_p1)
}
 0x427   :  { %781 = dma.vmem_to_hbm [thread:$0]  %s779_s29, 32, %s1495_s13, [#allocation6]  }
 0x428   :  { %1188 = dma.done.wait [#allocation6], 32  }
 0x429   :  { %1189 = vsyncadd [#allocation6], 4294967264 }
 0x42a   :  { %785 = vsyncpa [#allocation5], 1 }
 0x42b   :  { %786 = vsyncpa [#allocation8], 1 }
 0x42c   :  { %787 = vsyncpa [#allocation11], 1 }
 0x42d   :  { %788 = vsyncpa [#allocation14], 1 }
 0x42e   :  { %789 = vsyncpa [#allocation17], 1 }
 0x42f   :  { %790 = vsyncpa [#allocation6], 1 }

</bundles_post_ra>
